<compile_context>
chip_gen: v7x
topology: tpu7x:2x2x1
jax: 0.10.0
libtpu: 0.0.40
codegen_flags: <defaults>
</compile_context>

<pallas_src>
import functools
import math

import jax
import jax.numpy as jnp
from jax.experimental import pallas as pl
from jax.experimental.pallas import tpu as pltpu


_LN_EPS = 1e-12
_VMEM_LIMIT = 48 * 1024 * 1024   # fits v7x 64 MiB physical VMEM; plenty on v5e/v6e


def _gelu(y):
    # TODO(synk): HF BERT default is erf-gelu; tanh approximation (gelu_new) used here.
    return 0.5 * y * (1.0 + jnp.tanh(0.7978845608028654 * (y + 0.044715 * y * y * y)))


def _tile(dim, pref, align):
    """Largest tile <= pref that divides dim and is a multiple of align; full dim if small."""
    if dim <= pref:
        return dim
    best = None
    t = align
    while t <= pref:
        if dim % t == 0:
            best = t
        t += align
    return best if best is not None else dim


# ----------------------------------------------------------------------------
# Tiled matmul kernel: bias (+ optional GELU) (+ optional residual-add+LayerNorm)
# ----------------------------------------------------------------------------
def _matmul_kernel(x_ref, w_ref, b_ref, *refs, activation, add_ln, eps):
    if add_ln:
        res_ref, g_ref, beta_ref, o_ref, acc_ref = refs
    else:
        o_ref, acc_ref = refs
    kk = pl.program_id(2)

    @pl.when(kk == 0)
    def _():
        acc_ref[...] = jnp.zeros_like(acc_ref)

    acc_ref[...] += jnp.dot(x_ref[...], w_ref[...],
                            preferred_element_type=jnp.float32)

    @pl.when(kk == pl.num_programs(2) - 1)
    def _():
        y = acc_ref[...] + b_ref[...]                       # f32 epilogue
        if activation == "gelu":
            y = _gelu(y)
        if add_ln:
            h = y + res_ref[...].astype(jnp.float32)
            mu = jnp.mean(h, axis=-1, keepdims=True)
            var = jnp.mean(jnp.square(h - mu), axis=-1, keepdims=True)
            y = (h - mu) * jax.lax.rsqrt(var + eps) * g_ref[...] + beta_ref[...]
        o_ref[...] = y.astype(o_ref.dtype)


def matmul(x, w, b, *, activation=None, residual=None, gamma=None, beta=None,
           out_dtype=jnp.bfloat16, eps=_LN_EPS,
           tm_pref=256, tn_pref=512, tk_pref=512):
    M, K = x.shape
    Kw, N = w.shape
    assert K == Kw
    add_ln = residual is not None

    tm = _tile(M, tm_pref, 8)
    tk = _tile(K, tk_pref, 128)
    # add+LayerNorm epilogue needs the full output row in one tile.
    tn = N if add_ln else _tile(N, tn_pref, 128)
    grid = (M // tm, N // tn, K // tk)

    in_specs = [
        pl.BlockSpec((tm, tk), lambda i, j, k: (i, k)),
        pl.BlockSpec((tk, tn), lambda i, j, k: (k, j)),
        pl.BlockSpec((1, tn), lambda i, j, k: (0, j)),
    ]
    args = [x, w, b.reshape(1, N).astype(jnp.float32)]
    if add_ln:
        in_specs += [
            pl.BlockSpec((tm, tn), lambda i, j, k: (i, j)),
            pl.BlockSpec((1, tn), lambda i, j, k: (0, j)),
            pl.BlockSpec((1, tn), lambda i, j, k: (0, j)),
        ]
        args += [residual,
                 gamma.reshape(1, N).astype(jnp.float32),
                 beta.reshape(1, N).astype(jnp.float32)]

    return pl.pallas_call(
        functools.partial(_matmul_kernel, activation=activation,
                          add_ln=add_ln, eps=eps),
        out_shape=jax.ShapeDtypeStruct((M, N), out_dtype),
        grid=grid,
        in_specs=in_specs,
        out_specs=pl.BlockSpec((tm, tn), lambda i, j, k: (i, j)),
        scratch_shapes=[pltpu.VMEM((tm, tn), jnp.float32)],
        compiler_params=pltpu.CompilerParams(
            dimension_semantics=("parallel", "parallel", "arbitrary"),
            vmem_limit_bytes=_VMEM_LIMIT),
    )(*args)


# ----------------------------------------------------------------------------
# Fused FFN kernel: x @ w1 -> GELU -> @ w2 -> + residual -> LayerNorm
# (the (tm, intermediate) activation stays in VMEM; no HBM round trip)
# ----------------------------------------------------------------------------
def _ffn_kernel(x_ref, w1_ref, b1_ref, w2_ref, b2_ref, g_ref, beta_ref, o_ref, *, eps):
    x = x_ref[...]                                                       # (tm, H) bf16
    h = jnp.dot(x, w1_ref[...], preferred_element_type=jnp.float32) + b1_ref[...]
    h = _gelu(h)                                                         # (tm, I) f32 in VMEM
    y = jnp.dot(h.astype(w2_ref.dtype), w2_ref[...],
                preferred_element_type=jnp.float32) + b2_ref[...]
    r = y + x.astype(jnp.float32)                                        # residual add
    mu = jnp.mean(r, axis=-1, keepdims=True)
    var = jnp.mean(jnp.square(r - mu), axis=-1, keepdims=True)
    o_ref[...] = ((r - mu) * jax.lax.rsqrt(var + eps) * g_ref[...]
                  + beta_ref[...]).astype(o_ref.dtype)


def ffn(x, w1, b1, w2, b2, gamma, beta, *, eps=_LN_EPS, tm_pref=256):
    M, H = x.shape
    _, I = w1.shape
    tm = _tile(M, tm_pref, 8)
    return pl.pallas_call(
        functools.partial(_ffn_kernel, eps=eps),
        out_shape=jax.ShapeDtypeStruct((M, H), x.dtype),
        grid=(M // tm,),
        in_specs=[
            pl.BlockSpec((tm, H), lambda i: (i, 0)),
            pl.BlockSpec((H, I), lambda i: (0, 0)),
            pl.BlockSpec((1, I), lambda i: (0, 0)),
            pl.BlockSpec((I, H), lambda i: (0, 0)),
            pl.BlockSpec((1, H), lambda i: (0, 0)),
            pl.BlockSpec((1, H), lambda i: (0, 0)),
            pl.BlockSpec((1, H), lambda i: (0, 0)),
        ],
        out_specs=pl.BlockSpec((tm, H), lambda i: (i, 0)),
        compiler_params=pltpu.CompilerParams(
            dimension_semantics=("parallel",),
            vmem_limit_bytes=_VMEM_LIMIT),
    )(x, w1, b1.reshape(1, I).astype(jnp.float32), w2,
      b2.reshape(1, H).astype(jnp.float32),
      gamma.reshape(1, H).astype(jnp.float32),
      beta.reshape(1, H).astype(jnp.float32))


# ----------------------------------------------------------------------------
# Row-tiled LayerNorm (embeddings)
# ----------------------------------------------------------------------------
def _ln_kernel(x_ref, g_ref, b_ref, o_ref, *, eps):
    x = x_ref[...].astype(jnp.float32)
    mu = jnp.mean(x, axis=-1, keepdims=True)
    var = jnp.mean(jnp.square(x - mu), axis=-1, keepdims=True)
    o_ref[...] = ((x - mu) * jax.lax.rsqrt(var + eps) * g_ref[...]
                  + b_ref[...]).astype(o_ref.dtype)


def layernorm(x, gamma, beta, *, out_dtype=jnp.bfloat16, eps=_LN_EPS, tm_pref=512):
    M, H = x.shape
    tm = _tile(M, tm_pref, 8)
    return pl.pallas_call(
        functools.partial(_ln_kernel, eps=eps),
        out_shape=jax.ShapeDtypeStruct((M, H), out_dtype),
        grid=(M // tm,),
        in_specs=[pl.BlockSpec((tm, H), lambda i: (i, 0)),
                  pl.BlockSpec((1, H), lambda i: (0, 0)),
                  pl.BlockSpec((1, H), lambda i: (0, 0))],
        out_specs=pl.BlockSpec((tm, H), lambda i: (i, 0)),
        compiler_params=pltpu.CompilerParams(
            dimension_semantics=("parallel",),
            vmem_limit_bytes=_VMEM_LIMIT),
    )(x, gamma.reshape(1, H).astype(jnp.float32),
      beta.reshape(1, H).astype(jnp.float32))


# ----------------------------------------------------------------------------
# Multi-head self-attention: a block of heads per grid step, batched einsums
# ----------------------------------------------------------------------------
def _attn_kernel(q_ref, k_ref, v_ref, bias_ref, o_ref, *, scale):
    q = q_ref[0]                                  # (hb, S, Dh) bf16
    k = k_ref[0]
    v = v_ref[0]
    s = jnp.einsum("hqd,hkd->hqk", q, k,
                   preferred_element_type=jnp.float32) * scale
    s = s + bias_ref[...]                         # (1, 1, S) broadcasts over (hb, S, S)
    m = jnp.max(s, axis=-1, keepdims=True)
    p = jnp.exp(s - m)
    l = jnp.sum(p, axis=-1, keepdims=True)
    p = p * pl.reciprocal(l, approx=True)
    ctx = jnp.einsum("hqk,hkd->hqd", p.astype(v.dtype), v,
                     preferred_element_type=jnp.float32)
    o_ref[0] = ctx.astype(o_ref.dtype)


def mha_attention(q, k, v, bias, scale, *, head_block=None):
    # q, k, v: (B, nH, S, Dh) bf16; bias: (B, 1, S) f32 additive mask.
    B, nH, S, Dh = q.shape
    if head_block is None:
        head_block = nH if nH <= 4 else max(
            hb for hb in range(1, 5) if nH % hb == 0)
    hb = head_block
    qkv_spec = pl.BlockSpec((1, hb, S, Dh), lambda b, h: (b, h, 0, 0))
    return pl.pallas_call(
        functools.partial(_attn_kernel, scale=scale),
        out_shape=jax.ShapeDtypeStruct((B, nH, S, Dh), jnp.bfloat16),
        grid=(B, nH // hb),
        in_specs=[qkv_spec, qkv_spec, qkv_spec,
                  pl.BlockSpec((1, 1, S), lambda b, h: (b, 0, 0))],
        out_specs=pl.BlockSpec((1, hb, S, Dh), lambda b, h: (b, h, 0, 0)),
        compiler_params=pltpu.CompilerParams(
            dimension_semantics=("parallel", "parallel"),
            vmem_limit_bytes=_VMEM_LIMIT),
    )(q, k, v, bias)


# ----------------------------------------------------------------------------
# Parameter construction (deterministic, synthetic)
# ----------------------------------------------------------------------------
def init_params(key, cfg):
    H = cfg["hidden"]
    I = cfg["intermediate"]
    L = cfg["num_labels"]
    Lp = ((L + 127) // 128) * 128          # lane-dense classifier output

    def normal(k, shape, scale=0.02):
        return scale * jax.random.normal(k, shape, dtype=jnp.float32)

    keys = iter(jax.random.split(key, 8 + 16 * cfg["layers"]))
    cls_w = normal(next(keys), (H, L))
    cls_w_pad = jnp.zeros((H, Lp), jnp.float32).at[:, :L].set(cls_w)

    params = {
        "word_emb": normal(next(keys), (cfg["vocab"], H)),
        "pos_emb": normal(next(keys), (cfg["max_pos"], H)),
        "type_emb": normal(next(keys), (cfg["type_vocab"], H)),
        "emb_ln_g": jnp.ones((H,), jnp.float32),
        "emb_ln_b": jnp.zeros((H,), jnp.float32),
        "cls_w_pad": cls_w_pad.astype(jnp.bfloat16),
        "cls_b_pad": jnp.zeros((Lp,), jnp.float32),
        "layers": [],
    }
    for _ in range(cfg["layers"]):
        wq = normal(next(keys), (H, H))
        wk = normal(next(keys), (H, H))
        wv = normal(next(keys), (H, H))
        layer = {
            # fused QKV weight: (H, 3H), column order [q | k | v]
            "w_qkv": jnp.concatenate([wq, wk, wv], axis=1).astype(jnp.bfloat16),
            "b_qkv": jnp.zeros((3 * H,), jnp.float32),
            "wo": normal(next(keys), (H, H)).astype(jnp.bfloat16),
            "bo": jnp.zeros((H,), jnp.float32),
            "ln1_g": jnp.ones((H,), jnp.float32), "ln1_b": jnp.zeros((H,), jnp.float32),
            "w1": normal(next(keys), (H, I)).astype(jnp.bfloat16),
            "b1": jnp.zeros((I,), jnp.float32),
            "w2": normal(next(keys), (I, H)).astype(jnp.bfloat16),
            "b2": jnp.zeros((H,), jnp.float32),
            "ln2_g": jnp.ones((H,), jnp.float32), "ln2_b": jnp.zeros((H,), jnp.float32),
        }
        params["layers"].append(layer)
    return params


# ----------------------------------------------------------------------------
# Forward pass (BERT encoder + dropout[eval identity] + detection classifier)
# ----------------------------------------------------------------------------
def bert_detect_forward(params, input_ids, attention_mask, token_type_ids, cfg):
    B, S = input_ids.shape
    H = cfg["hidden"]
    nH = cfg["heads"]
    Dh = H // nH
    M = B * S
    L = cfg["num_labels"]

    # --- embeddings (gathers stay in XLA; LayerNorm runs in Pallas) ---
    emb = (params["word_emb"][input_ids]
           + params["pos_emb"][jnp.arange(S)][None, :, :]
           + params["type_emb"][token_type_ids])                       # (B, S, H) f32
    x = layernorm(emb.reshape(M, H), params["emb_ln_g"], params["emb_ln_b"])  # bf16
    # dropout: identity (eval mode)

    # --- additive attention mask (per key position) ---
    bias = ((1.0 - attention_mask.astype(jnp.float32)) * -10000.0).reshape(B, 1, S)
    scale = 1.0 / math.sqrt(Dh)

    for layer in params["layers"]:
        # fused QKV projection: one (M, H) x (H, 3H) matmul
        qkv = matmul(x, layer["w_qkv"], layer["b_qkv"])                # (M, 3H) bf16
        # TODO(synk): head split/merge transposes left to XLA glue; fully in-kernel
        # head slicing would need sub-128-lane blocks.
        qkv = qkv.reshape(B, S, 3, nH, Dh)
        q = qkv[:, :, 0].transpose(0, 2, 1, 3)                         # (B, nH, S, Dh)
        k = qkv[:, :, 1].transpose(0, 2, 1, 3)
        v = qkv[:, :, 2].transpose(0, 2, 1, 3)

        ctx = mha_attention(q, k, v, bias, scale)                      # (B, nH, S, Dh)
        ctx = ctx.transpose(0, 2, 1, 3).reshape(M, H)                  # bf16

        # output projection with fused residual-add + LayerNorm epilogue
        x = matmul(ctx, layer["wo"], layer["bo"],
                   residual=x, gamma=layer["ln1_g"], beta=layer["ln1_b"])
        # dropout: identity (eval mode)

        # fused FFN: w1 -> GELU -> w2 -> + residual -> LayerNorm
        x = ffn(x, layer["w1"], layer["b1"], layer["w2"], layer["b2"],
                layer["ln2_g"], layer["ln2_b"])
        # dropout: identity (eval mode)

    # self.dropout(sequence_output): identity (eval mode)
    logits = matmul(x, params["cls_w_pad"], params["cls_b_pad"],
                    out_dtype=jnp.float32)                             # (M, 128) lane-dense
    logits = logits[:, :L]
    return logits.reshape(B, S, L)


# ----------------------------------------------------------------------------
# Driver
# ----------------------------------------------------------------------------
if __name__ == "__main__":
    cfg = dict(
        vocab=100, max_pos=64, type_vocab=2,
        hidden=32, heads=2, layers=2, intermediate=64,
        num_labels=3,
    )
    B, S = 2, 8

    key = jax.random.PRNGKey(0)
    k_params, k_ids = jax.random.split(key)
    params = init_params(k_params, cfg)

    input_ids = jax.random.randint(k_ids, (B, S), 0, cfg["vocab"], dtype=jnp.int32)
    token_type_ids = jnp.zeros((B, S), dtype=jnp.int32)
    attention_mask = jnp.ones((B, S), dtype=jnp.int32).at[1, S - 2:].set(0)  # pad tail of 2nd seq

    fwd = jax.jit(functools.partial(bert_detect_forward, cfg=cfg))
    logits = fwd(params, input_ids, attention_mask, token_type_ids)
    jax.block_until_ready(logits)

    assert logits.shape == (B, S, cfg["num_labels"])
    assert jnp.all(jnp.isfinite(logits))
    print("KERNEL_OK")
</pallas_src>

<mosaic_0001>
module attributes {stable_mosaic.version = 11 : i64} {
  func.func @_ln_kernel(%arg0: i32, %arg1: memref<16x32xf32, #tpu.memory_space<vmem>>, %arg2: memref<1x32xf32, #tpu.memory_space<vmem>>, %arg3: memref<1x32xf32, #tpu.memory_space<vmem>>, %arg4: memref<16x32xbf16, #tpu.memory_space<vmem>>) attributes {dimension_semantics = [#tpu.dimension_semantics<parallel>], iteration_bounds = array<i64: 1>, scalar_prefetch = 0 : i64, scratch_operands = 0 : i64, tpu.core_type = #tpu.core_type<tc>, window_params = [{transform_indices = @transform_0, window_bounds = array<i64: 16, 32>}, {pipeline_mode = #tpu.pipeline_mode<synchronous>, transform_indices = @transform_1, window_bounds = array<i64: 1, 32>}, {pipeline_mode = #tpu.pipeline_mode<synchronous>, transform_indices = @transform_2, window_bounds = array<i64: 1, 32>}, {transform_indices = @transform_3, window_bounds = array<i64: 16, 32>}]} {
    %c0 = arith.constant 0 : index
    %c0_0 = arith.constant 0 : index
    %0 = vector.load %arg1[%c0, %c0_0] : memref<16x32xf32, #tpu.memory_space<vmem>>, vector<16x32xf32>
    %cst = arith.constant dense<0.000000e+00> : vector<16xf32>
    %1 = vector.multi_reduction <add>, %0, %cst [1] : vector<16x32xf32> to vector<16xf32>
    %2 = vector.shape_cast %1 : vector<16xf32> to vector<16x1xf32>
    %cst_1 = arith.constant 3.200000e+01 : f32
    %3 = vector.broadcast %cst_1 : f32 to vector<16x1xf32>
    %4 = arith.divf %2, %3 : vector<16x1xf32>
    %5 = vector.broadcast %4 : vector<16x1xf32> to vector<16x32xf32>
    %6 = arith.subf %0, %5 : vector<16x32xf32>
    %7 = arith.mulf %6, %6 : vector<16x32xf32>
    %cst_2 = arith.constant dense<0.000000e+00> : vector<16xf32>
    %8 = vector.multi_reduction <add>, %7, %cst_2 [1] : vector<16x32xf32> to vector<16xf32>
    %9 = vector.shape_cast %8 : vector<16xf32> to vector<16x1xf32>
    %cst_3 = arith.constant 3.200000e+01 : f32
    %10 = vector.broadcast %cst_3 : f32 to vector<16x1xf32>
    %11 = arith.divf %9, %10 : vector<16x1xf32>
    %12 = vector.broadcast %4 : vector<16x1xf32> to vector<16x32xf32>
    %13 = arith.subf %0, %12 : vector<16x32xf32>
    %cst_4 = arith.constant 9.99999996E-13 : f32
    %14 = vector.broadcast %cst_4 : f32 to vector<16x1xf32>
    %15 = arith.addf %11, %14 : vector<16x1xf32>
    %16 = math.rsqrt %15 : vector<16x1xf32>
    %17 = vector.broadcast %16 : vector<16x1xf32> to vector<16x32xf32>
    %18 = arith.mulf %13, %17 : vector<16x32xf32>
    %c0_5 = arith.constant 0 : index
    %c0_6 = arith.constant 0 : index
    %19 = vector.load %arg2[%c0_5, %c0_6] : memref<1x32xf32, #tpu.memory_space<vmem>>, vector<1x32xf32>
    %20 = vector.broadcast %19 : vector<1x32xf32> to vector<16x32xf32>
    %21 = arith.mulf %18, %20 : vector<16x32xf32>
    %c0_7 = arith.constant 0 : index
    %c0_8 = arith.constant 0 : index
    %22 = vector.load %arg3[%c0_7, %c0_8] : memref<1x32xf32, #tpu.memory_space<vmem>>, vector<1x32xf32>
    %23 = vector.broadcast %22 : vector<1x32xf32> to vector<16x32xf32>
    %24 = arith.addf %21, %23 : vector<16x32xf32>
    %25 = arith.truncf %24 : vector<16x32xf32> to vector<16x32xbf16>
    %c0_9 = arith.constant 0 : index
    %c0_10 = arith.constant 0 : index
    %26 = vector.load %arg4[%c0_9, %c0_10] : memref<16x32xbf16, #tpu.memory_space<vmem>>, vector<16x32xbf16>
    tpu.vector_store %arg4[%c0_9, %c0_10], %25 {strides = array<i32>} : memref<16x32xbf16, #tpu.memory_space<vmem>>, vector<16x32xbf16>,
    return
  }
  func.func @transform_0(%arg0: i32) -> (i32, i32) {
    %c0_i32 = arith.constant 0 : i32
    %c0_i32_0 = arith.constant 0 : i32
    return %arg0, %c0_i32 : i32, i32
  }
  func.func @transform_1(%arg0: i32) -> (i32, i32) {
    %c0_i32 = arith.constant 0 : i32
    %c0_i32_0 = arith.constant 0 : i32
    %c0_i32_1 = arith.constant 0 : i32
    return %c0_i32, %c0_i32_0 : i32, i32
  }
  func.func @transform_2(%arg0: i32) -> (i32, i32) {
    %c0_i32 = arith.constant 0 : i32
    %c0_i32_0 = arith.constant 0 : i32
    %c0_i32_1 = arith.constant 0 : i32
    return %c0_i32, %c0_i32_0 : i32, i32
  }
  func.func @transform_3(%arg0: i32) -> (i32, i32) {
    %c0_i32 = arith.constant 0 : i32
    %c0_i32_0 = arith.constant 0 : i32
    return %arg0, %c0_i32 : i32, i32
  }
}

module attributes {stable_mosaic.version = 11 : i64} {
  func.func @_matmul_kernel(%arg0: i32, %arg1: i32, %arg2: i32, %arg3: memref<16x32xbf16, #tpu.memory_space<vmem>>, %arg4: memref<32x96xbf16, #tpu.memory_space<vmem>>, %arg5: memref<1x96xf32, #tpu.memory_space<vmem>>, %arg6: memref<16x96xbf16, #tpu.memory_space<vmem>>, %arg7: memref<16x96xf32, #tpu.memory_space<vmem>>) attributes {dimension_semantics = [#tpu.dimension_semantics<parallel>, #tpu.dimension_semantics<parallel>, #tpu.dimension_semantics<arbitrary>], iteration_bounds = array<i64: 1, 1, 1>, scalar_prefetch = 0 : i64, scratch_operands = 1 : i64, tpu.core_type = #tpu.core_type<tc>, window_params = [{transform_indices = @transform_0, window_bounds = array<i64: 16, 32>}, {transform_indices = @transform_1, window_bounds = array<i64: 32, 96>}, {transform_indices = @transform_2, window_bounds = array<i64: 1, 96>}, {transform_indices = @transform_3, window_bounds = array<i64: 16, 96>}]} {
    %c0_i32 = arith.constant 0 : i32
    %0 = arith.cmpi eq, %arg2, %c0_i32 : i32
    %1 = arith.extui %0 : i1 to i32
    %c0_i32_0 = arith.constant 0 : i32
    %2 = arith.cmpi ne, %1, %c0_i32_0 : i32
    scf.if %2 {
      %cst_10 = arith.constant 0.000000e+00 : f32
      %12 = vector.broadcast %cst_10 : f32 to vector<16x96xf32>
      %c0_11 = arith.constant 0 : index
      %c0_12 = arith.constant 0 : index
      %13 = vector.load %arg7[%c0_11, %c0_12] : memref<16x96xf32, #tpu.memory_space<vmem>>, vector<16x96xf32>
      tpu.vector_store %arg7[%c0_11, %c0_12], %12 {strides = array<i32>} : memref<16x96xf32, #tpu.memory_space<vmem>>, vector<16x96xf32>,
    } else {
    }
    %c0 = arith.constant 0 : index
    %c0_1 = arith.constant 0 : index
    %3 = vector.load %arg7[%c0, %c0_1] : memref<16x96xf32, #tpu.memory_space<vmem>>, vector<16x96xf32>
    %c0_2 = arith.constant 0 : index
    %c0_3 = arith.constant 0 : index
    %4 = vector.load %arg3[%c0_2, %c0_3] : memref<16x32xbf16, #tpu.memory_space<vmem>>, vector<16x32xbf16>
    %c0_4 = arith.constant 0 : index
    %c0_5 = arith.constant 0 : index
    %5 = vector.load %arg4[%c0_4, %c0_5] : memref<32x96xbf16, #tpu.memory_space<vmem>>, vector<32x96xbf16>
    %cst = arith.constant dense<0.000000e+00> : vector<16x96xf32>
    %6 = tpu.matmul %4, %5, %cst {dimension_numbers = #tpu.dot_dimension_numbers<[1], [0], [0], [1], [0, 0, 1, 1], [], []>} : vector<16x32xbf16>, vector<32x96xbf16>, vector<16x96xf32> -> vector<16x96xf32>
    %7 = arith.addf %3, %6 : vector<16x96xf32>
    %c0_6 = arith.constant 0 : index
    %c0_7 = arith.constant 0 : index
    %8 = vector.load %arg7[%c0_6, %c0_7] : memref<16x96xf32, #tpu.memory_space<vmem>>, vector<16x96xf32>
    tpu.vector_store %arg7[%c0_6, %c0_7], %7 {strides = array<i32>} : memref<16x96xf32, #tpu.memory_space<vmem>>, vector<16x96xf32>,
    %c0_i32_8 = arith.constant 0 : i32
    %9 = arith.cmpi eq, %arg2, %c0_i32_8 : i32
    %10 = arith.extui %9 : i1 to i32
    %c0_i32_9 = arith.constant 0 : i32
    %11 = arith.cmpi ne, %10, %c0_i32_9 : i32
    scf.if %11 {
      %c0_10 = arith.constant 0 : index
      %c0_11 = arith.constant 0 : index
      %12 = vector.load %arg7[%c0_10, %c0_11] : memref<16x96xf32, #tpu.memory_space<vmem>>, vector<16x96xf32>
      %c0_12 = arith.constant 0 : index
      %c0_13 = arith.constant 0 : index
      %13 = vector.load %arg5[%c0_12, %c0_13] : memref<1x96xf32, #tpu.memory_space<vmem>>, vector<1x96xf32>
      %14 = vector.broadcast %13 : vector<1x96xf32> to vector<16x96xf32>
      %15 = arith.addf %12, %14 : vector<16x96xf32>
      %16 = arith.truncf %15 : vector<16x96xf32> to vector<16x96xbf16>
      %c0_14 = arith.constant 0 : index
      %c0_15 = arith.constant 0 : index
      %17 = vector.load %arg6[%c0_14, %c0_15] : memref<16x96xbf16, #tpu.memory_space<vmem>>, vector<16x96xbf16>
      tpu.vector_store %arg6[%c0_14, %c0_15], %16 {strides = array<i32>} : memref<16x96xbf16, #tpu.memory_space<vmem>>, vector<16x96xbf16>,
    } else {
    }
    return
  }
  func.func @transform_0(%arg0: i32, %arg1: i32, %arg2: i32) -> (i32, i32) {
    %c0_i32 = arith.constant 0 : i32
    return %arg0, %arg2 : i32, i32
  }
  func.func @transform_1(%arg0: i32, %arg1: i32, %arg2: i32) -> (i32, i32) {
    %c0_i32 = arith.constant 0 : i32
    return %arg2, %arg1 : i32, i32
  }
  func.func @transform_2(%arg0: i32, %arg1: i32, %arg2: i32) -> (i32, i32) {
    %c0_i32 = arith.constant 0 : i32
    %c0_i32_0 = arith.constant 0 : i32
    return %c0_i32, %arg1 : i32, i32
  }
  func.func @transform_3(%arg0: i32, %arg1: i32, %arg2: i32) -> (i32, i32) {
    %c0_i32 = arith.constant 0 : i32
    return %arg0, %arg1 : i32, i32
  }
}

module attributes {stable_mosaic.version = 11 : i64} {
  func.func @_attn_kernel(%arg0: i32, %arg1: i32, %arg2: memref<1x2x8x16xbf16, #tpu.memory_space<vmem>>, %arg3: memref<1x2x8x16xbf16, #tpu.memory_space<vmem>>, %arg4: memref<1x2x8x16xbf16, #tpu.memory_space<vmem>>, %arg5: memref<1x1x8xf32, #tpu.memory_space<vmem>>, %arg6: memref<1x2x8x16xbf16, #tpu.memory_space<vmem>>) attributes {dimension_semantics = [#tpu.dimension_semantics<parallel>, #tpu.dimension_semantics<parallel>], iteration_bounds = array<i64: 2, 1>, scalar_prefetch = 0 : i64, scratch_operands = 0 : i64, tpu.core_type = #tpu.core_type<tc>, window_params = [{transform_indices = @transform_0, window_bounds = array<i64: 1, 2, 8, 16>}, {transform_indices = @transform_1, window_bounds = array<i64: 1, 2, 8, 16>}, {transform_indices = @transform_2, window_bounds = array<i64: 1, 2, 8, 16>}, {transform_indices = @transform_3, window_bounds = array<i64: 1, 1, 8>}, {transform_indices = @transform_4, window_bounds = array<i64: 1, 2, 8, 16>}]} {
    %c0 = arith.constant 0 : index
    %c0_0 = arith.constant 0 : index
    %c0_1 = arith.constant 0 : index
    %c0_2 = arith.constant 0 : index
    %0 = vector.load %arg2[%c0, %c0_0, %c0_1, %c0_2] : memref<1x2x8x16xbf16, #tpu.memory_space<vmem>>, vector<1x2x8x16xbf16>
    %1 = vector.shape_cast %0 : vector<1x2x8x16xbf16> to vector<2x8x16xbf16>
    %c0_3 = arith.constant 0 : index
    %c0_4 = arith.constant 0 : index
    %c0_5 = arith.constant 0 : index
    %c0_6 = arith.constant 0 : index
    %2 = vector.load %arg3[%c0_3, %c0_4, %c0_5, %c0_6] : memref<1x2x8x16xbf16, #tpu.memory_space<vmem>>, vector<1x2x8x16xbf16>
    %3 = vector.shape_cast %2 : vector<1x2x8x16xbf16> to vector<2x8x16xbf16>
    %c0_7 = arith.constant 0 : index
    %c0_8 = arith.constant 0 : index
    %c0_9 = arith.constant 0 : index
    %c0_10 = arith.constant 0 : index
    %4 = vector.load %arg4[%c0_7, %c0_8, %c0_9, %c0_10] : memref<1x2x8x16xbf16, #tpu.memory_space<vmem>>, vector<1x2x8x16xbf16>
    %5 = vector.shape_cast %4 : vector<1x2x8x16xbf16> to vector<2x8x16xbf16>
    "tpu.trace_start"() <{level = 10 : i32, message = "hqd,hkd->hqk"}> : () -> ()
    %cst = arith.constant dense<0.000000e+00> : vector<2x8x8xf32>
    %6 = tpu.matmul %1, %3, %cst {dimension_numbers = #tpu.dot_dimension_numbers<[2], [2], [1], [1], [0, 0, 0, 1, 1, 1], [0], [0]>} : vector<2x8x16xbf16>, vector<2x8x16xbf16>, vector<2x8x8xf32> -> vector<2x8x8xf32>
    "tpu.trace_stop"() : () -> ()
    %cst_11 = arith.constant 2.500000e-01 : f32
    %7 = vector.broadcast %cst_11 : f32 to vector<2x8x8xf32>
    %8 = arith.mulf %6, %7 : vector<2x8x8xf32>
    %c0_12 = arith.constant 0 : index
    %c0_13 = arith.constant 0 : index
    %c0_14 = arith.constant 0 : index
    %9 = vector.load %arg5[%c0_12, %c0_13, %c0_14] : memref<1x1x8xf32, #tpu.memory_space<vmem>>, vector<1x1x8xf32>
    %10 = vector.broadcast %9 : vector<1x1x8xf32> to vector<2x8x8xf32>
    %11 = arith.addf %8, %10 : vector<2x8x8xf32>
    %cst_15 = arith.constant dense<0xFF800000> : vector<2x8xf32>
    %12 = vector.multi_reduction <maximumf>, %11, %cst_15 [2] : vector<2x8x8xf32> to vector<2x8xf32>
    %13 = vector.shape_cast %12 : vector<2x8xf32> to vector<2x8x1xf32>
    %14 = vector.broadcast %13 : vector<2x8x1xf32> to vector<2x8x8xf32>
    %15 = arith.subf %11, %14 : vector<2x8x8xf32>
    %16 = math.exp %15 : vector<2x8x8xf32>
    %cst_16 = arith.constant dense<0.000000e+00> : vector<2x8xf32>
    %17 = vector.multi_reduction <add>, %16, %cst_16 [2] : vector<2x8x8xf32> to vector<2x8xf32>
    %18 = vector.shape_cast %17 : vector<2x8xf32> to vector<2x8x1xf32>
    %19 = tpu.reciprocal %18 {approx = true} : vector<2x8x1xf32> -> vector<2x8x1xf32>
    %20 = vector.broadcast %19 : vector<2x8x1xf32> to vector<2x8x8xf32>
    %21 = arith.mulf %16, %20 : vector<2x8x8xf32>
    %22 = arith.truncf %21 : vector<2x8x8xf32> to vector<2x8x8xbf16>
    "tpu.trace_start"() <{level = 10 : i32, message = "hqk,hkd->hqd"}> : () -> ()
    %cst_17 = arith.constant dense<0.000000e+00> : vector<2x8x16xf32>
    %23 = tpu.matmul %22, %5, %cst_17 {dimension_numbers = #tpu.dot_dimension_numbers<[2], [1], [1], [2], [0, 0, 0, 1, 1, 2], [0], [0]>} : vector<2x8x8xbf16>, vector<2x8x16xbf16>, vector<2x8x16xf32> -> vector<2x8x16xf32>
    "tpu.trace_stop"() : () -> ()
    %24 = arith.truncf %23 : vector<2x8x16xf32> to vector<2x8x16xbf16>
    %c0_18 = arith.constant 0 : index
    %c0_19 = arith.constant 0 : index
    %c0_20 = arith.constant 0 : index
    %c0_21 = arith.constant 0 : index
    %25 = vector.load %arg6[%c0_18, %c0_19, %c0_20, %c0_21] : memref<1x2x8x16xbf16, #tpu.memory_space<vmem>>, vector<1x2x8x16xbf16>
    %26 = vector.shape_cast %25 : vector<1x2x8x16xbf16> to vector<2x8x16xbf16>
    %27 = vector.shape_cast %24 : vector<2x8x16xbf16> to vector<1x2x8x16xbf16>
    tpu.vector_store %arg6[%c0_18, %c0_19, %c0_20, %c0_21], %27 {strides = array<i32>} : memref<1x2x8x16xbf16, #tpu.memory_space<vmem>>, vector<1x2x8x16xbf16>,
    return
  }
  func.func @transform_0(%arg0: i32, %arg1: i32) -> (i32, i32, i32, i32) {
    %c0_i32 = arith.constant 0 : i32
    %c0_i32_0 = arith.constant 0 : i32
    %c0_i32_1 = arith.constant 0 : i32
    return %arg0, %arg1, %c0_i32, %c0_i32_0 : i32, i32, i32, i32
  }
  func.func @transform_1(%arg0: i32, %arg1: i32) -> (i32, i32, i32, i32) {
    %c0_i32 = arith.constant 0 : i32
    %c0_i32_0 = arith.constant 0 : i32
    %c0_i32_1 = arith.constant 0 : i32
    return %arg0, %arg1, %c0_i32, %c0_i32_0 : i32, i32, i32, i32
  }
  func.func @transform_2(%arg0: i32, %arg1: i32) -> (i32, i32, i32, i32) {
    %c0_i32 = arith.constant 0 : i32
    %c0_i32_0 = arith.constant 0 : i32
    %c0_i32_1 = arith.constant 0 : i32
    return %arg0, %arg1, %c0_i32, %c0_i32_0 : i32, i32, i32, i32
  }
  func.func @transform_3(%arg0: i32, %arg1: i32) -> (i32, i32, i32) {
    %c0_i32 = arith.constant 0 : i32
    %c0_i32_0 = arith.constant 0 : i32
    %c0_i32_1 = arith.constant 0 : i32
    return %arg0, %c0_i32, %c0_i32_0 : i32, i32, i32
  }
  func.func @transform_4(%arg0: i32, %arg1: i32) -> (i32, i32, i32, i32) {
    %c0_i32 = arith.constant 0 : i32
    %c0_i32_0 = arith.constant 0 : i32
    %c0_i32_1 = arith.constant 0 : i32
    return %arg0, %arg1, %c0_i32, %c0_i32_0 : i32, i32, i32, i32
  }
}

module attributes {stable_mosaic.version = 11 : i64} {
  func.func @_matmul_kernel(%arg0: i32, %arg1: i32, %arg2: i32, %arg3: memref<16x32xbf16, #tpu.memory_space<vmem>>, %arg4: memref<32x32xbf16, #tpu.memory_space<vmem>>, %arg5: memref<1x32xf32, #tpu.memory_space<vmem>>, %arg6: memref<16x32xbf16, #tpu.memory_space<vmem>>, %arg7: memref<1x32xf32, #tpu.memory_space<vmem>>, %arg8: memref<1x32xf32, #tpu.memory_space<vmem>>, %arg9: memref<16x32xbf16, #tpu.memory_space<vmem>>, %arg10: memref<16x32xf32, #tpu.memory_space<vmem>>) attributes {dimension_semantics = [#tpu.dimension_semantics<parallel>, #tpu.dimension_semantics<parallel>, #tpu.dimension_semantics<arbitrary>], iteration_bounds = array<i64: 1, 1, 1>, scalar_prefetch = 0 : i64, scratch_operands = 1 : i64, tpu.core_type = #tpu.core_type<tc>, window_params = [{transform_indices = @transform_0, window_bounds = array<i64: 16, 32>}, {transform_indices = @transform_1, window_bounds = array<i64: 32, 32>}, {transform_indices = @transform_2, window_bounds = array<i64: 1, 32>}, {transform_indices = @transform_3, window_bounds = array<i64: 16, 32>}, {transform_indices = @transform_4, window_bounds = array<i64: 1, 32>}, {transform_indices = @transform_5, window_bounds = array<i64: 1, 32>}, {transform_indices = @transform_6, window_bounds = array<i64: 16, 32>}]} {
    %c0_i32 = arith.constant 0 : i32
    %0 = arith.cmpi eq, %arg2, %c0_i32 : i32
    %1 = arith.extui %0 : i1 to i32
    %c0_i32_0 = arith.constant 0 : i32
    %2 = arith.cmpi ne, %1, %c0_i32_0 : i32
    scf.if %2 {
      %cst_10 = arith.constant 0.000000e+00 : f32
      %12 = vector.broadcast %cst_10 : f32 to vector<16x32xf32>
      %c0_11 = arith.constant 0 : index
      %c0_12 = arith.constant 0 : index
      %13 = vector.load %arg10[%c0_11, %c0_12] : memref<16x32xf32, #tpu.memory_space<vmem>>, vector<16x32xf32>
      tpu.vector_store %arg10[%c0_11, %c0_12], %12 {strides = array<i32>} : memref<16x32xf32, #tpu.memory_space<vmem>>, vector<16x32xf32>,
    } else {
    }
    %c0 = arith.constant 0 : index
    %c0_1 = arith.constant 0 : index
    %3 = vector.load %arg10[%c0, %c0_1] : memref<16x32xf32, #tpu.memory_space<vmem>>, vector<16x32xf32>
    %c0_2 = arith.constant 0 : index
    %c0_3 = arith.constant 0 : index
    %4 = vector.load %arg3[%c0_2, %c0_3] : memref<16x32xbf16, #tpu.memory_space<vmem>>, vector<16x32xbf16>
    %c0_4 = arith.constant 0 : index
    %c0_5 = arith.constant 0 : index
    %5 = vector.load %arg4[%c0_4, %c0_5] : memref<32x32xbf16, #tpu.memory_space<vmem>>, vector<32x32xbf16>
    %cst = arith.constant dense<0.000000e+00> : vector<16x32xf32>
    %6 = tpu.matmul %4, %5, %cst {dimension_numbers = #tpu.dot_dimension_numbers<[1], [0], [0], [1], [0, 0, 1, 1], [], []>} : vector<16x32xbf16>, vector<32x32xbf16>, vector<16x32xf32> -> vector<16x32xf32>
    %7 = arith.addf %3, %6 : vector<16x32xf32>
    %c0_6 = arith.constant 0 : index
    %c0_7 = arith.constant 0 : index
    %8 = vector.load %arg10[%c0_6, %c0_7] : memref<16x32xf32, #tpu.memory_space<vmem>>, vector<16x32xf32>
    tpu.vector_store %arg10[%c0_6, %c0_7], %7 {strides = array<i32>} : memref<16x32xf32, #tpu.memory_space<vmem>>, vector<16x32xf32>,
    %c0_i32_8 = arith.constant 0 : i32
    %9 = arith.cmpi eq, %arg2, %c0_i32_8 : i32
    %10 = arith.extui %9 : i1 to i32
    %c0_i32_9 = arith.constant 0 : i32
    %11 = arith.cmpi ne, %10, %c0_i32_9 : i32
    scf.if %11 {
      %c0_10 = arith.constant 0 : index
      %c0_11 = arith.constant 0 : index
      %12 = vector.load %arg10[%c0_10, %c0_11] : memref<16x32xf32, #tpu.memory_space<vmem>>, vector<16x32xf32>
      %c0_12 = arith.constant 0 : index
      %c0_13 = arith.constant 0 : index
      %13 = vector.load %arg5[%c0_12, %c0_13] : memref<1x32xf32, #tpu.memory_space<vmem>>, vector<1x32xf32>
      %14 = vector.broadcast %13 : vector<1x32xf32> to vector<16x32xf32>
      %15 = arith.addf %12, %14 : vector<16x32xf32>
      %c0_14 = arith.constant 0 : index
      %c0_15 = arith.constant 0 : index
      %16 = vector.load %arg6[%c0_14, %c0_15] : memref<16x32xbf16, #tpu.memory_space<vmem>>, vector<16x32xbf16>
      %17 = arith.extf %16 : vector<16x32xbf16> to vector<16x32xf32>
      %18 = arith.addf %15, %17 : vector<16x32xf32>
      %cst_16 = arith.constant dense<0.000000e+00> : vector<16xf32>
      %19 = vector.multi_reduction <add>, %18, %cst_16 [1] : vector<16x32xf32> to vector<16xf32>
      %20 = vector.shape_cast %19 : vector<16xf32> to vector<16x1xf32>
      %cst_17 = arith.constant 3.200000e+01 : f32
      %21 = vector.broadcast %cst_17 : f32 to vector<16x1xf32>
      %22 = arith.divf %20, %21 : vector<16x1xf32>
      %23 = vector.broadcast %22 : vector<16x1xf32> to vector<16x32xf32>
      %24 = arith.subf %18, %23 : vector<16x32xf32>
      %25 = arith.mulf %24, %24 : vector<16x32xf32>
      %cst_18 = arith.constant dense<0.000000e+00> : vector<16xf32>
      %26 = vector.multi_reduction <add>, %25, %cst_18 [1] : vector<16x32xf32> to vector<16xf32>
      %27 = vector.shape_cast %26 : vector<16xf32> to vector<16x1xf32>
      %cst_19 = arith.constant 3.200000e+01 : f32
      %28 = vector.broadcast %cst_19 : f32 to vector<16x1xf32>
      %29 = arith.divf %27, %28 : vector<16x1xf32>
      %30 = vector.broadcast %22 : vector<16x1xf32> to vector<16x32xf32>
      %31 = arith.subf %18, %30 : vector<16x32xf32>
      %cst_20 = arith.constant 9.99999996E-13 : f32
      %32 = vector.broadcast %cst_20 : f32 to vector<16x1xf32>
      %33 = arith.addf %29, %32 : vector<16x1xf32>
      %34 = math.rsqrt %33 : vector<16x1xf32>
      %35 = vector.broadcast %34 : vector<16x1xf32> to vector<16x32xf32>
      %36 = arith.mulf %31, %35 : vector<16x32xf32>
      %c0_21 = arith.constant 0 : index
      %c0_22 = arith.constant 0 : index
      %37 = vector.load %arg7[%c0_21, %c0_22] : memref<1x32xf32, #tpu.memory_space<vmem>>, vector<1x32xf32>
      %38 = vector.broadcast %37 : vector<1x32xf32> to vector<16x32xf32>
      %39 = arith.mulf %36, %38 : vector<16x32xf32>
      %c0_23 = arith.constant 0 : index
      %c0_24 = arith.constant 0 : index
      %40 = vector.load %arg8[%c0_23, %c0_24] : memref<1x32xf32, #tpu.memory_space<vmem>>, vector<1x32xf32>
      %41 = vector.broadcast %40 : vector<1x32xf32> to vector<16x32xf32>
      %42 = arith.addf %39, %41 : vector<16x32xf32>
      %43 = arith.truncf %42 : vector<16x32xf32> to vector<16x32xbf16>
      %c0_25 = arith.constant 0 : index
      %c0_26 = arith.constant 0 : index
      %44 = vector.load %arg9[%c0_25, %c0_26] : memref<16x32xbf16, #tpu.memory_space<vmem>>, vector<16x32xbf16>
      tpu.vector_store %arg9[%c0_25, %c0_26], %43 {strides = array<i32>} : memref<16x32xbf16, #tpu.memory_space<vmem>>, vector<16x32xbf16>,
    } else {
    }
    return
  }
  func.func @transform_0(%arg0: i32, %arg1: i32, %arg2: i32) -> (i32, i32) {
    %c0_i32 = arith.constant 0 : i32
    return %arg0, %arg2 : i32, i32
  }
  func.func @transform_1(%arg0: i32, %arg1: i32, %arg2: i32) -> (i32, i32) {
    %c0_i32 = arith.constant 0 : i32
    return %arg2, %arg1 : i32, i32
  }
  func.func @transform_2(%arg0: i32, %arg1: i32, %arg2: i32) -> (i32, i32) {
    %c0_i32 = arith.constant 0 : i32
    %c0_i32_0 = arith.constant 0 : i32
    return %c0_i32, %arg1 : i32, i32
  }
  func.func @transform_3(%arg0: i32, %arg1: i32, %arg2: i32) -> (i32, i32) {
    %c0_i32 = arith.constant 0 : i32
    return %arg0, %arg1 : i32, i32
  }
  func.func @transform_4(%arg0: i32, %arg1: i32, %arg2: i32) -> (i32, i32) {
    %c0_i32 = arith.constant 0 : i32
    %c0_i32_0 = arith.constant 0 : i32
    return %c0_i32, %arg1 : i32, i32
  }
  func.func @transform_5(%arg0: i32, %arg1: i32, %arg2: i32) -> (i32, i32) {
    %c0_i32 = arith.constant 0 : i32
    %c0_i32_0 = arith.constant 0 : i32
    return %c0_i32, %arg1 : i32, i32
  }
  func.func @transform_6(%arg0: i32, %arg1: i32, %arg2: i32) -> (i32, i32) {
    %c0_i32 = arith.constant 0 : i32
    return %arg0, %arg1 : i32, i32
  }
}

module attributes {stable_mosaic.version = 11 : i64} {
  func.func @_ffn_kernel(%arg0: i32, %arg1: memref<16x32xbf16, #tpu.memory_space<vmem>>, %arg2: memref<32x64xbf16, #tpu.memory_space<vmem>>, %arg3: memref<1x64xf32, #tpu.memory_space<vmem>>, %arg4: memref<64x32xbf16, #tpu.memory_space<vmem>>, %arg5: memref<1x32xf32, #tpu.memory_space<vmem>>, %arg6: memref<1x32xf32, #tpu.memory_space<vmem>>, %arg7: memref<1x32xf32, #tpu.memory_space<vmem>>, %arg8: memref<16x32xbf16, #tpu.memory_space<vmem>>) attributes {dimension_semantics = [#tpu.dimension_semantics<parallel>], iteration_bounds = array<i64: 1>, scalar_prefetch = 0 : i64, scratch_operands = 0 : i64, tpu.core_type = #tpu.core_type<tc>, window_params = [{transform_indices = @transform_0, window_bounds = array<i64: 16, 32>}, {pipeline_mode = #tpu.pipeline_mode<synchronous>, transform_indices = @transform_1, window_bounds = array<i64: 32, 64>}, {pipeline_mode = #tpu.pipeline_mode<synchronous>, transform_indices = @transform_2, window_bounds = array<i64: 1, 64>}, {pipeline_mode = #tpu.pipeline_mode<synchronous>, transform_indices = @transform_3, window_bounds = array<i64: 64, 32>}, {pipeline_mode = #tpu.pipeline_mode<synchronous>, transform_indices = @transform_4, window_bounds = array<i64: 1, 32>}, {pipeline_mode = #tpu.pipeline_mode<synchronous>, transform_indices = @transform_5, window_bounds = array<i64: 1, 32>}, {pipeline_mode = #tpu.pipeline_mode<synchronous>, transform_indices = @transform_6, window_bounds = array<i64: 1, 32>}, {transform_indices = @transform_7, window_bounds = array<i64: 16, 32>}]} {
    %c0 = arith.constant 0 : index
    %c0_0 = arith.constant 0 : index
    %0 = vector.load %arg1[%c0, %c0_0] : memref<16x32xbf16, #tpu.memory_space<vmem>>, vector<16x32xbf16>
    %c0_1 = arith.constant 0 : index
    %c0_2 = arith.constant 0 : index
    %1 = vector.load %arg2[%c0_1, %c0_2] : memref<32x64xbf16, #tpu.memory_space<vmem>>, vector<32x64xbf16>
    %cst = arith.constant dense<0.000000e+00> : vector<16x64xf32>
    %2 = tpu.matmul %0, %1, %cst {dimension_numbers = #tpu.dot_dimension_numbers<[1], [0], [0], [1], [0, 0, 1, 1], [], []>} : vector<16x32xbf16>, vector<32x64xbf16>, vector<16x64xf32> -> vector<16x64xf32>
    %c0_3 = arith.constant 0 : index
    %c0_4 = arith.constant 0 : index
    %3 = vector.load %arg3[%c0_3, %c0_4] : memref<1x64xf32, #tpu.memory_space<vmem>>, vector<1x64xf32>
    %4 = vector.broadcast %3 : vector<1x64xf32> to vector<16x64xf32>
    %5 = arith.addf %2, %4 : vector<16x64xf32>
    %cst_5 = arith.constant 5.000000e-01 : f32
    %6 = vector.broadcast %cst_5 : f32 to vector<16x64xf32>
    %7 = arith.mulf %6, %5 : vector<16x64xf32>
    %cst_6 = arith.constant 4.471500e-02 : f32
    %8 = vector.broadcast %cst_6 : f32 to vector<16x64xf32>
    %9 = arith.mulf %8, %5 : vector<16x64xf32>
    %10 = arith.mulf %9, %5 : vector<16x64xf32>
    %11 = arith.mulf %10, %5 : vector<16x64xf32>
    %12 = arith.addf %5, %11 : vector<16x64xf32>
    %cst_7 = arith.constant 0.797884583 : f32
    %13 = vector.broadcast %cst_7 : f32 to vector<16x64xf32>
    %14 = arith.mulf %13, %12 : vector<16x64xf32>
    %15 = math.tanh %14 : vector<16x64xf32>
    %cst_8 = arith.constant 1.000000e+00 : f32
    %16 = vector.broadcast %cst_8 : f32 to vector<16x64xf32>
    %17 = arith.addf %16, %15 : vector<16x64xf32>
    %18 = arith.mulf %7, %17 : vector<16x64xf32>
    %19 = arith.truncf %18 : vector<16x64xf32> to vector<16x64xbf16>
    %c0_9 = arith.constant 0 : index
    %c0_10 = arith.constant 0 : index
    %20 = vector.load %arg4[%c0_9, %c0_10] : memref<64x32xbf16, #tpu.memory_space<vmem>>, vector<64x32xbf16>
    %cst_11 = arith.constant dense<0.000000e+00> : vector<16x32xf32>
    %21 = tpu.matmul %19, %20, %cst_11 {dimension_numbers = #tpu.dot_dimension_numbers<[1], [0], [0], [1], [0, 0, 1, 1], [], []>} : vector<16x64xbf16>, vector<64x32xbf16>, vector<16x32xf32> -> vector<16x32xf32>
    %c0_12 = arith.constant 0 : index
    %c0_13 = arith.constant 0 : index
    %22 = vector.load %arg5[%c0_12, %c0_13] : memref<1x32xf32, #tpu.memory_space<vmem>>, vector<1x32xf32>
    %23 = vector.broadcast %22 : vector<1x32xf32> to vector<16x32xf32>
    %24 = arith.addf %21, %23 : vector<16x32xf32>
    %25 = arith.extf %0 : vector<16x32xbf16> to vector<16x32xf32>
    %26 = arith.addf %24, %25 : vector<16x32xf32>
    %cst_14 = arith.constant dense<0.000000e+00> : vector<16xf32>
    %27 = vector.multi_reduction <add>, %26, %cst_14 [1] : vector<16x32xf32> to vector<16xf32>
    %28 = vector.shape_cast %27 : vector<16xf32> to vector<16x1xf32>
    %cst_15 = arith.constant 3.200000e+01 : f32
    %29 = vector.broadcast %cst_15 : f32 to vector<16x1xf32>
    %30 = arith.divf %28, %29 : vector<16x1xf32>
    %31 = vector.broadcast %30 : vector<16x1xf32> to vector<16x32xf32>
    %32 = arith.subf %26, %31 : vector<16x32xf32>
    %33 = arith.mulf %32, %32 : vector<16x32xf32>
    %cst_16 = arith.constant dense<0.000000e+00> : vector<16xf32>
    %34 = vector.multi_reduction <add>, %33, %cst_16 [1] : vector<16x32xf32> to vector<16xf32>
    %35 = vector.shape_cast %34 : vector<16xf32> to vector<16x1xf32>
    %cst_17 = arith.constant 3.200000e+01 : f32
    %36 = vector.broadcast %cst_17 : f32 to vector<16x1xf32>
    %37 = arith.divf %35, %36 : vector<16x1xf32>
    %38 = vector.broadcast %30 : vector<16x1xf32> to vector<16x32xf32>
    %39 = arith.subf %26, %38 : vector<16x32xf32>
    %cst_18 = arith.constant 9.99999996E-13 : f32
    %40 = vector.broadcast %cst_18 : f32 to vector<16x1xf32>
    %41 = arith.addf %37, %40 : vector<16x1xf32>
    %42 = math.rsqrt %41 : vector<16x1xf32>
    %43 = vector.broadcast %42 : vector<16x1xf32> to vector<16x32xf32>
    %44 = arith.mulf %39, %43 : vector<16x32xf32>
    %c0_19 = arith.constant 0 : index
    %c0_20 = arith.constant 0 : index
    %45 = vector.load %arg6[%c0_19, %c0_20] : memref<1x32xf32, #tpu.memory_space<vmem>>, vector<1x32xf32>
    %46 = vector.broadcast %45 : vector<1x32xf32> to vector<16x32xf32>
    %47 = arith.mulf %44, %46 : vector<16x32xf32>
    %c0_21 = arith.constant 0 : index
    %c0_22 = arith.constant 0 : index
    %48 = vector.load %arg7[%c0_21, %c0_22] : memref<1x32xf32, #tpu.memory_space<vmem>>, vector<1x32xf32>
    %49 = vector.broadcast %48 : vector<1x32xf32> to vector<16x32xf32>
    %50 = arith.addf %47, %49 : vector<16x32xf32>
    %51 = arith.truncf %50 : vector<16x32xf32> to vector<16x32xbf16>
    %c0_23 = arith.constant 0 : index
    %c0_24 = arith.constant 0 : index
    %52 = vector.load %arg8[%c0_23, %c0_24] : memref<16x32xbf16, #tpu.memory_space<vmem>>, vector<16x32xbf16>
    tpu.vector_store %arg8[%c0_23, %c0_24], %51 {strides = array<i32>} : memref<16x32xbf16, #tpu.memory_space<vmem>>, vector<16x32xbf16>,
    return
  }
  func.func @transform_0(%arg0: i32) -> (i32, i32) {
    %c0_i32 = arith.constant 0 : i32
    %c0_i32_0 = arith.constant 0 : i32
    return %arg0, %c0_i32 : i32, i32
  }
  func.func @transform_1(%arg0: i32) -> (i32, i32) {
    %c0_i32 = arith.constant 0 : i32
    %c0_i32_0 = arith.constant 0 : i32
    %c0_i32_1 = arith.constant 0 : i32
    return %c0_i32, %c0_i32_0 : i32, i32
  }
  func.func @transform_2(%arg0: i32) -> (i32, i32) {
    %c0_i32 = arith.constant 0 : i32
    %c0_i32_0 = arith.constant 0 : i32
    %c0_i32_1 = arith.constant 0 : i32
    return %c0_i32, %c0_i32_0 : i32, i32
  }
  func.func @transform_3(%arg0: i32) -> (i32, i32) {
    %c0_i32 = arith.constant 0 : i32
    %c0_i32_0 = arith.constant 0 : i32
    %c0_i32_1 = arith.constant 0 : i32
    return %c0_i32, %c0_i32_0 : i32, i32
  }
  func.func @transform_4(%arg0: i32) -> (i32, i32) {
    %c0_i32 = arith.constant 0 : i32
    %c0_i32_0 = arith.constant 0 : i32
    %c0_i32_1 = arith.constant 0 : i32
    return %c0_i32, %c0_i32_0 : i32, i32
  }
  func.func @transform_5(%arg0: i32) -> (i32, i32) {
    %c0_i32 = arith.constant 0 : i32
    %c0_i32_0 = arith.constant 0 : i32
    %c0_i32_1 = arith.constant 0 : i32
    return %c0_i32, %c0_i32_0 : i32, i32
  }
  func.func @transform_6(%arg0: i32) -> (i32, i32) {
    %c0_i32 = arith.constant 0 : i32
    %c0_i32_0 = arith.constant 0 : i32
    %c0_i32_1 = arith.constant 0 : i32
    return %c0_i32, %c0_i32_0 : i32, i32
  }
  func.func @transform_7(%arg0: i32) -> (i32, i32) {
    %c0_i32 = arith.constant 0 : i32
    %c0_i32_0 = arith.constant 0 : i32
    return %arg0, %c0_i32 : i32, i32
  }
}

module attributes {stable_mosaic.version = 11 : i64} {
  func.func @_matmul_kernel(%arg0: i32, %arg1: i32, %arg2: i32, %arg3: memref<16x32xbf16, #tpu.memory_space<vmem>>, %arg4: memref<32x128xbf16, #tpu.memory_space<vmem>>, %arg5: memref<1x128xf32, #tpu.memory_space<vmem>>, %arg6: memref<16x128xf32, #tpu.memory_space<vmem>>, %arg7: memref<16x128xf32, #tpu.memory_space<vmem>>) attributes {dimension_semantics = [#tpu.dimension_semantics<parallel>, #tpu.dimension_semantics<parallel>, #tpu.dimension_semantics<arbitrary>], iteration_bounds = array<i64: 1, 1, 1>, scalar_prefetch = 0 : i64, scratch_operands = 1 : i64, tpu.core_type = #tpu.core_type<tc>, window_params = [{transform_indices = @transform_0, window_bounds = array<i64: 16, 32>}, {transform_indices = @transform_1, window_bounds = array<i64: 32, 128>}, {transform_indices = @transform_2, window_bounds = array<i64: 1, 128>}, {transform_indices = @transform_3, window_bounds = array<i64: 16, 128>}]} {
    %c0_i32 = arith.constant 0 : i32
    %0 = arith.cmpi eq, %arg2, %c0_i32 : i32
    %1 = arith.extui %0 : i1 to i32
    %c0_i32_0 = arith.constant 0 : i32
    %2 = arith.cmpi ne, %1, %c0_i32_0 : i32
    scf.if %2 {
      %cst_10 = arith.constant 0.000000e+00 : f32
      %12 = vector.broadcast %cst_10 : f32 to vector<16x128xf32>
      %c0_11 = arith.constant 0 : index
      %c0_12 = arith.constant 0 : index
      %13 = vector.load %arg7[%c0_11, %c0_12] : memref<16x128xf32, #tpu.memory_space<vmem>>, vector<16x128xf32>
      tpu.vector_store %arg7[%c0_11, %c0_12], %12 {strides = array<i32>} : memref<16x128xf32, #tpu.memory_space<vmem>>, vector<16x128xf32>,
    } else {
    }
    %c0 = arith.constant 0 : index
    %c0_1 = arith.constant 0 : index
    %3 = vector.load %arg7[%c0, %c0_1] : memref<16x128xf32, #tpu.memory_space<vmem>>, vector<16x128xf32>
    %c0_2 = arith.constant 0 : index
    %c0_3 = arith.constant 0 : index
    %4 = vector.load %arg3[%c0_2, %c0_3] : memref<16x32xbf16, #tpu.memory_space<vmem>>, vector<16x32xbf16>
    %c0_4 = arith.constant 0 : index
    %c0_5 = arith.constant 0 : index
    %5 = vector.load %arg4[%c0_4, %c0_5] : memref<32x128xbf16, #tpu.memory_space<vmem>>, vector<32x128xbf16>
    %cst = arith.constant dense<0.000000e+00> : vector<16x128xf32>
    %6 = tpu.matmul %4, %5, %cst {dimension_numbers = #tpu.dot_dimension_numbers<[1], [0], [0], [1], [0, 0, 1, 1], [], []>} : vector<16x32xbf16>, vector<32x128xbf16>, vector<16x128xf32> -> vector<16x128xf32>
    %7 = arith.addf %3, %6 : vector<16x128xf32>
    %c0_6 = arith.constant 0 : index
    %c0_7 = arith.constant 0 : index
    %8 = vector.load %arg7[%c0_6, %c0_7] : memref<16x128xf32, #tpu.memory_space<vmem>>, vector<16x128xf32>
    tpu.vector_store %arg7[%c0_6, %c0_7], %7 {strides = array<i32>} : memref<16x128xf32, #tpu.memory_space<vmem>>, vector<16x128xf32>,
    %c0_i32_8 = arith.constant 0 : i32
    %9 = arith.cmpi eq, %arg2, %c0_i32_8 : i32
    %10 = arith.extui %9 : i1 to i32
    %c0_i32_9 = arith.constant 0 : i32
    %11 = arith.cmpi ne, %10, %c0_i32_9 : i32
    scf.if %11 {
      %c0_10 = arith.constant 0 : index
      %c0_11 = arith.constant 0 : index
      %12 = vector.load %arg7[%c0_10, %c0_11] : memref<16x128xf32, #tpu.memory_space<vmem>>, vector<16x128xf32>
      %c0_12 = arith.constant 0 : index
      %c0_13 = arith.constant 0 : index
      %13 = vector.load %arg5[%c0_12, %c0_13] : memref<1x128xf32, #tpu.memory_space<vmem>>, vector<1x128xf32>
      %14 = vector.broadcast %13 : vector<1x128xf32> to vector<16x128xf32>
      %15 = arith.addf %12, %14 : vector<16x128xf32>
      %c0_14 = arith.constant 0 : index
      %c0_15 = arith.constant 0 : index
      %16 = vector.load %arg6[%c0_14, %c0_15] : memref<16x128xf32, #tpu.memory_space<vmem>>, vector<16x128xf32>
      tpu.vector_store %arg6[%c0_14, %c0_15], %15 {strides = array<i32>} : memref<16x128xf32, #tpu.memory_space<vmem>>, vector<16x128xf32>,
    } else {
    }
    return
  }
  func.func @transform_0(%arg0: i32, %arg1: i32, %arg2: i32) -> (i32, i32) {
    %c0_i32 = arith.constant 0 : i32
    return %arg0, %arg2 : i32, i32
  }
  func.func @transform_1(%arg0: i32, %arg1: i32, %arg2: i32) -> (i32, i32) {
    %c0_i32 = arith.constant 0 : i32
    return %arg2, %arg1 : i32, i32
  }
  func.func @transform_2(%arg0: i32, %arg1: i32, %arg2: i32) -> (i32, i32) {
    %c0_i32 = arith.constant 0 : i32
    %c0_i32_0 = arith.constant 0 : i32
    return %c0_i32, %arg1 : i32, i32
  }
  func.func @transform_3(%arg0: i32, %arg1: i32, %arg2: i32) -> (i32, i32) {
    %c0_i32 = arith.constant 0 : i32
    return %arg0, %arg1 : i32, i32
  }
}

</mosaic_0001>

<bundles_post_ra>
// kernel: bert_detect_forward.10
= control target key start
LH: loop header
LB: loop body
LE: loop exit
PB: predicated region body
PF: predicated region fallthrough
CT: control target
= control target key end

     0   :  { %vm16_vm0 = vcmask 261120   ;;  %vm70_vm1 = vcmask 257024   ;;  %s129_s0 = inlined_call_operand.vmem [shape: f32[16,32], index: 0, kind: input, shape index: {}]   ;;  %s130_s1 = inlined_call_operand.vmem [shape: f32[1,32], index: 1, kind: input, shape index: {}]   ;;  %s131_s2 = inlined_call_operand.vmem [shape: f32[1,32], index: 2, kind: input, shape index: {}]   ;;  %s132_s3 = inlined_call_operand.vmem [shape: bf16[16,32], index: 3, kind: output, shape index: {}]  }
   0x1   :  { %v14_v0 = vld [vmem:[%s129_s0] sm:$0xff]  ;;  %v15_v1 = vld [vmem:[%s129_s0 + $0x8] sm:$0xff] }
   0x2   :  { %v17_v2 = vsel %vm16_vm0, %v14_v0, 0.0  ;;  %v20_v3 = vsel %vm16_vm0, %v15_v1, 0.0  ;;  %v77_v21 = vld [vmem:[%s130_s1] ss:$0 sm:$0xff] }
   0x3   :  { %18 = vadd.xlane.f32.xlu0 %v17_v2  ;;  %v78_v23 = vld [vmem:[%s131_s2] ss:$0 sm:$0xff] }
   0x7   :  { %21 = vadd.xlane.f32.xlu0 %v20_v3 }
  0x90   :  { %v19_v4 = vpop.xlane.xlu0 %18 }
  0x91   :  { %v24_v5 = vmul.f32 0.03125, %v19_v4 }
  0x93   :  { %v26_v6 = vsub.f32 %v14_v0, %v24_v5 }
  0x94   :  { %v22_v7 = vpop.xlane.xlu0 %21 }
  0x95   :  { %v25_v8 = vmul.f32 0.03125, %v22_v7  ;;  %v28_v9 = vmul.f32 %v26_v6, %v26_v6 }
  0x97   :  { %v27_v10 = vsub.f32 %v15_v1, %v25_v8  ;;  %v30_v11 = vsel %vm16_vm0, %v28_v9, 0.0 }
  0x98   :  { %31 = vadd.xlane.f32.xlu1 %v30_v11 }
  0x99   :  { %v29_v12 = vmul.f32 %v27_v10, %v27_v10 }
  0x9b   :  { %v33_v13 = vsel %vm16_vm0, %v29_v12, 0.0 }
  0x9c   :  { %34 = vadd.xlane.f32.xlu1 %v33_v13 }
 0x125   :  { %v32_v14 = vpop.xlane.xlu1 %31 }
 0x126   :  { %v36_v15 = vmul.f32 0.03125, %v32_v14 }
 0x128   :  { %v38_v16 = vadd.f32 1e-12, %v36_v15 }
 0x129   :  { %v35_v17 = vpop.xlane.xlu1 %34 }
 0x12a   :  { %83 = vrsqrt.f32 %v38_v16  ;;  %v37_v18 = vmul.f32 0.03125, %v35_v17 }
 0x12c   :  { %v39_v19 = vadd.f32 1e-12, %v37_v18 }
 0x12e   :  { %85 = vrsqrt.f32 %v39_v19 }
 0x134   :  { %v84_v20 = vpop.eup %83 }
 0x135   :  { %v42_v22 = vmul.f32 %v84_v20, %v26_v6 }
 0x137   :  { %v51_v24 = vmul.f32 %v77_v21, %v42_v22 }
 0x138   :  { %v86_v25 = vpop.eup %85 }
 0x139   :  { %v60_v26 = vadd.f32 %v78_v23, %v51_v24  ;;  %v43_v27 = vmul.f32 %v86_v25, %v27_v10 }
 0x13b   :  { %v81_v28 = vpack.c.bf16 %v60_v26, %v60_v26  ;;  %v52_v29 = vmul.f32 %v77_v21, %v43_v27 }
 0x13d   :  { %71 = vst.msk [vmem:[%s132_s3] sm:$0xf] %vm70_vm1, %v81_v28  ;;  %v61_v30 = vadd.f32 %v78_v23, %v52_v29 }
 0x13f   :  { %v82_v31 = vpack.c.bf16 %v61_v30, %v61_v30 }
 0x141   :  { %72 = vst.msk [vmem:[%s132_s3 + $0x4] sm:$0xf] %vm70_vm1, %v82_v31 }

// kernel: bert_detect_forward.11
= control target key start
LH: loop header
LB: loop body
LE: loop exit
PB: predicated region body
PF: predicated region fallthrough
CT: control target
= control target key end

     0   :  { %vm19_vm0 = vcmask 785408   ;;  %v151_v0 = vmov 0.0   ;;  %vm152_vm1 = vmmov 0   ;;  %vm47_vm2 = vcmask 261120   ;;  %s195_s1 = inlined_call_operand.vmem [shape: bf16[32,96], index: 1, kind: input, shape index: {}]   ;;  %s196_s0 = inlined_call_operand.vmem [shape: bf16[16,32], index: 0, kind: input, shape index: {}]   ;;  %s197_s2 = inlined_call_operand.vmem [shape: f32[1,96], index: 2, kind: input, shape index: {}]   ;;  %s198_s3 = inlined_call_operand.vmem [shape: bf16[16,96], index: 3, kind: output, shape index: {}]  }
   0x1   :  { %138 = vmatprep.subr.bf16.mxu0 %v151_v0  ;;  %v148_v1 = vld [vmem:[%s195_s1] sm:$0xff]   ;;  %142 = vmatprep.mubr.msk.bf16.mxu0 %vm152_vm1, %v151_v0  ;;  %20 = vst.msk [vmem:[#allocation2] sm:$0xff] %vm19_vm0, %v151_v0  ;;  %21 = vst.msk [vmem:[#allocation2 + $0x8] sm:$0xff] %vm19_vm0, %v151_v0  ;;  %v149_v2 = vld [vmem:[%s195_s1 + $0x8] sm:$0xff]   ;;  %vm119_vm3 = vcmask 781312  }
   0x2   :  { %139 = vmatpush3.bf16.msra.mxu0 %v148_v1  ;;  %v150_v3 = vld [vmem:[%s196_s0] sm:$0xff]  }
   0x3   :  { %140 = vmatprep.subr.bf16.mxu0 %v151_v0  ;;  %v130_v12 = vld [vmem:[%s197_s2] ss:$0 sm:$0xff] }
   0x6   :  { %141 = vmatpush3.bf16.msra.mxu0 %v149_v2 }
   0x8   :  { %v22_v4 = vld [vmem:[#allocation2] sm:$0xff]  ;;  %v23_v6 = vld [vmem:[#allocation2 + $0x8] sm:$0xff] }
   0x9   :  { %143 = vmatmul.mubr.msk.bf16.vlgmr.msra.gmra.mrb[0].mxu0 %vm47_vm2, %v150_v3 }
  0xdc   :  { %v85_v5 = vpop.f32.mrb[0].mxu0 }
  0xdd   :  { %v92_v7 = vadd.f32 %v85_v5, %v22_v4  ;;  %v144_v8 = vpop.f32.mrb[1].mxu0 }
  0xde   :  { %v88_v9 = vpop.f32.mrb[2].mxu0 }
  0xdf   :  { %95 = vst.msk [vmem:[#allocation2] sm:$0xff] %vm19_vm0, %v92_v7  ;;  %v93_v10 = vadd.f32 %v88_v9, %v23_v6  ;;  %v145_v11 = vpop.f32.mrb[3].mxu0 }
  0xe1   :  { %96 = vst.msk [vmem:[#allocation2 + $0x8] sm:$0xff] %vm19_vm0, %v93_v10 }
  0xe6   :  { %v100_v13 = vld [vmem:[#allocation2] sm:$0xff] }
  0xe7   :  { %v109_v14 = vadd.f32 %v130_v12, %v100_v13 }
  0xe8   :  { %v101_v15 = vld [vmem:[#allocation2 + $0x8] sm:$0xff] }
  0xe9   :  { %v133_v16 = vpack.c.bf16 %v109_v14, %v109_v14  ;;  %v110_v17 = vadd.f32 %v130_v12, %v101_v15 }
  0xeb   :  { %120 = vst.msk [vmem:[%s198_s3] sm:$0xf] %vm119_vm3, %v133_v16  ;;  %v134_v18 = vpack.c.bf16 %v110_v17, %v110_v17 }
  0xed   :  { %121 = vst.msk [vmem:[%s198_s3 + $0x4] sm:$0xf] %vm119_vm3, %v134_v18 }

// kernel: bert_detect_forward.12
= control target key start
LH: loop header
LB: loop body
LE: loop exit
PB: predicated region body
PF: predicated region fallthrough
CT: control target
= control target key end

     0   :  { %s830_s15 = smov 0   ;;  %s832_s16 = smov 0   ;;  %s888_s0 = inlined_call_operand.vmem [shape: bf16[2,2,8,16], index: 0, kind: input, shape index: {}]   ;;  %s889_s1 = inlined_call_operand.vmem [shape: bf16[2,2,8,16], index: 1, kind: input, shape index: {}]   ;;  %s890_s2 = inlined_call_operand.vmem [shape: bf16[2,2,8,16], index: 2, kind: input, shape index: {}]   ;;  %s891_s3 = inlined_call_operand.vmem [shape: f32[2,1,8], index: 3, kind: input, shape index: {}]   ;;  %s892_s4 = inlined_call_operand.vmem [shape: bf16[2,2,8,16], index: 4, kind: output, shape index: {}]  }
   0x1   :  { %s834_s17 = smov 0  }
   0x2 LB: > { %s26_s18 = sadd.s32 1, %s797_s16  ;;  %p693_p0 = scmp.ge.s32.totalorder %s801_s17, 1  ;;  %s801_s17 = sphi %s834_s17, %s14_s17   ;;  %s797_s16 = sphi %s832_s16, %s894_s16   ;;  %s793_s15 = sphi %s830_s15, %s893_s15  }
   0x3   : > { %p28_p1 = scmp.ge.s32.totalorder %s26_s18, 2  ;;  %p225_p2 = scmp.lt.s32.totalorder %s801_s17, 3 }
   0x5   : > { %s896_s18 = smov (%p28_p1, %s26_s18), 0  ;;  %p226_p3 = pnand %p693_p0, %p225_p2 }
   0x6   : > { %p281_p4 = scmp.lt.s32.totalorder (!%p226_p3), %s793_s15, 1  ;;  %v803_v0 = vmov (!%p226_p3), 0.0   ;;  %vm804_vm0 = vmmov (!%p226_p3), 0   ;;  %vm330_vm1 = vcmask (!%p226_p3), 130048   ;;  %vm434_vm2 = vcmask (!%p226_p3), 64512  }
   0x7   : > { %229 = sbr.rel (%p226_p3) target bundleno = 777 (0x309), region = 36  ;;  %721 = vmatprep.subr.bf16.mxu0 (!%p226_p3), %v803_v0  ;;  %727 = vmatprep.subr.bf16.mxu1 (!%p226_p3), %v803_v0  ;;  %vm462_vm3 = vcmask (!%p226_p3), 1043456   ;;  %vm554_vm4 = vcmask (!%p226_p3), 125952  }
   0x8   : > { %723 = vmatprep.mubr.msk.bf16.mxu0 (!%p226_p3), %vm804_vm0, %v803_v0  ;;  %729 = vmatprep.mubr.msk.bf16.mxu1 (!%p226_p3), %vm804_vm0, %v803_v0 }
   0xe   : > { %s898_s15 = smov (!%p281_p4, %s793_s15), 1 }
   0xf   : > { %s850_s19 = sshll.u32 %s898_s15, 3  ;;  %s312_s28 = scalar_lea.vmem %s891_s3, %s898_s15 }
  0x10   : > { %s298_s22 = scalar_lea.vmem %s889_s1, %s850_s19  ;;  %s288_s25 = scalar_lea.vmem %s888_s0, %s850_s19  ;;  %v704_v9 = vld [vmem:[%s312_s28] ss:$0 sm:$0xff] }
  0x11   : > { %v326_v1 = vld [vmem:[%s298_s22] sm:$0xf]  ;;  %v327_v2 = vld [vmem:[%s298_s22 + $0x4] sm:$0xf]  ;;  %s308_s5 = scalar_lea.vmem %s890_s2, %s850_s19  ;;  %s321_s8 = scalar_lea.vmem %s892_s4, %s850_s19 }
  0x12   : > { %v335_v3 = vsel %vm330_vm1, %v326_v1, 0  ;;  %v381_v4 = vsel %vm330_vm1, %v327_v2, 0  ;;  %v324_v5 = vld [vmem:[%s288_s25] sm:$0xf]  ;;  %v325_v6 = vld [vmem:[%s288_s25 + $0x4] sm:$0xf] }
  0x13   : > { %722 = vmatpush3.bf16.xpose.msra.mxu0 %v335_v3  ;;  %728 = vmatpush3.bf16.xpose.msra.mxu1 %v381_v4  ;;  %v328_v32 = vld [vmem:[%s308_s5] sm:$0xf]  ;;  %v329_v34 = vld [vmem:[%s308_s5 + $0x4] sm:$0xf] }
  0x14   : > { %733 = vmatprep.subr.bf16.mxu0 %v803_v0  ;;  %739 = vmatprep.subr.bf16.mxu1 %v803_v0  ;;  %v464_v33 = vsel %vm462_vm3, %v328_v32, 0  ;;  %v510_v35 = vsel %vm462_vm3, %v329_v34, 0 }
  0x1a   : > { %724 = vmatmul.mubr.msk.bf16.vlgmr.msra.gmra.mrb[0].mxu0 %vm330_vm1, %v324_v5  ;;  %730 = vmatmul.mubr.msk.bf16.vlgmr.msra.gmra.mrb[0].mxu1 %vm330_vm1, %v325_v6 }
  0x1b   : > { %735 = vmatprep.mubr.msk.bf16.mxu0 %vm804_vm0, %v803_v0  ;;  %741 = vmatprep.mubr.msk.bf16.mxu1 %vm804_vm0, %v803_v0 }
  0x1c   : > { %734 = vmatpush3.bf16.msra.mxu0 %v464_v33  ;;  %740 = vmatpush3.bf16.msra.mxu1 %v510_v35 }
  0xed   : > { %v371_v7 = vpop.f32.mrb[0].mxu0  ;;  %v417_v8 = vpop.f32.mrb[0].mxu1 }
  0xee   : > { %v423_v10 = vmul.f32 0.25, %v371_v7  ;;  %v725_v11 = vpop.f32.mrb[1].mxu0  ;;  %v424_v12 = vmul.f32 0.25, %v417_v8  ;;  %v731_v13 = vpop.f32.mrb[1].mxu1 }
  0xef   : > { %v374_v14 = vpop.f32.mrb[2].mxu0  ;;  %v420_v15 = vpop.f32.mrb[2].mxu1 }
  0xf0   : > { %v726_v16 = vpop.f32.mrb[3].mxu0  ;;  %v732_v17 = vpop.f32.mrb[3].mxu1  ;;  %v432_v18 = vadd.f32 %v704_v9, %v423_v10  ;;  %v433_v19 = vadd.f32 %v704_v9, %v424_v12 }
  0xf2   : > { %v435_v20 = vsel %vm434_vm2, %v432_v18, -inf  ;;  %v438_v21 = vsel %vm434_vm2, %v433_v19, -inf }
  0xf3   : > { %436 = vmax.xlane.f32.xlu0 %v435_v20 }
  0xf7   : > { %439 = vmax.xlane.f32.xlu0 %v438_v21 }
 0x180   : > { %v437_v22 = vpop.xlane.xlu0 %436 }
 0x181   : > { %v441_v23 = vsub.f32 %v432_v18, %v437_v22 }
 0x183   : > { %v443_v24 = vmul.f32 1.442695, %v441_v23 }
 0x184   : > { %v440_v25 = vpop.xlane.xlu0 %439 }
 0x185   : > { %771 = vpow2.f32 %v443_v24  ;;  %v442_v26 = vsub.f32 %v433_v19, %v440_v25 }
 0x187   : > { %v445_v27 = vmul.f32 1.442695, %v442_v26 }
 0x189   : > { %773 = vpow2.f32 %v445_v27 }
 0x18f   : > { %v772_v28 = vpop.eup %771 }
 0x190   : > { %v447_v29 = vsel %vm434_vm2, %v772_v28, 0.0 }
 0x191   : > { %448 = vadd.xlane.f32.xlu1 %v447_v29 }
 0x193   : > { %v774_v30 = vpop.eup %773 }
 0x194   : > { %v450_v31 = vsel %vm434_vm2, %v774_v30, 0.0 }
 0x195   : > { %451 = vadd.xlane.f32.xlu1 %v450_v31 }
 0x21e   : > { %v449_v36 = vpop.xlane.xlu1 %448 }
 0x21f   : > { %775 = vrcp.f32 %v449_v36 }
 0x222   : > { %v452_v37 = vpop.xlane.xlu1 %451 }
 0x223   : > { %777 = vrcp.f32 %v452_v37 }
 0x229   : > { %v776_v38 = vpop.eup %775 }
 0x22a   : > { %v455_v39 = vmul.f32 %v776_v38, %v772_v28 }
 0x22c   : > { %v457_v40 = vpack.c.bf16 %v455_v39, %v455_v39 }
 0x22d   : > { %v778_v41 = vpop.eup %777 }
 0x22e   : > { %v456_v42 = vmul.f32 %v778_v41, %v774_v30  ;;  %736 = vmatmul.mubr.msk.bf16.vlgmr.msra.gmra.mrb[4].mxu0 %vm434_vm2, %v457_v40 }
 0x230   : > { %v458_v43 = vpack.c.bf16 %v456_v42, %v456_v42 }
 0x232   : > { %742 = vmatmul.mubr.msk.bf16.vlgmr.msra.gmra.mrb[4].mxu1 %vm434_vm2, %v458_v43 }
 0x301   : > { %v500_v44 = vpop.f32.mrb[4].mxu0 }
 0x302   : > { %v552_v45 = vpack.c.bf16 %v500_v44, %v500_v44  ;;  %v737_v46 = vpop.f32.mrb[5].mxu0 }
 0x303   : > { %v503_v47 = vpop.f32.mrb[6].mxu0 }
 0x304   : > { %555 = vst.msk [vmem:[%s321_s8] sm:$0xf] %vm554_vm4, %v552_v45  ;;  %v738_v48 = vpop.f32.mrb[7].mxu0 }
 0x305   : > { %v546_v49 = vpop.f32.mrb[4].mxu1 }
 0x306   : > { %v553_v50 = vpack.c.bf16 %v546_v49, %v546_v49  ;;  %v743_v51 = vpop.f32.mrb[5].mxu1 }
 0x307   : > { %v549_v52 = vpop.f32.mrb[6].mxu1 }
 0x308   : > { %556 = vst.msk [vmem:[%s321_s8 + $0x4] sm:$0xf] %vm554_vm4, %v553_v50  ;;  %v744_v53 = vpop.f32.mrb[7].mxu1 }
 0x309 PF: > { %s14_s17 = sadd.s32 1, %s801_s17   ;;  %s893_s15 = smov %s797_s16 }
 0x30a   : > { %p11_p5 = scmp.ge.s32.totalorder %s14_s17, 4   ;;  %s894_s16 = smov %s896_s18 }
 0x30c   :  { %13 = sbr.rel (!%p11_p5) target bundleno = 2 (0x2), region = 75 }

// kernel: bert_detect_forward.13
= control target key start
LH: loop header
LB: loop body
LE: loop exit
PB: predicated region body
PF: predicated region fallthrough
CT: control target
= control target key end

     0   :  { %vm28_vm0 = vcmask 261120   ;;  %v220_v0 = vmov 0.0   ;;  %vm221_vm1 = vmmov 0   ;;  %vm178_vm2 = vcmask 257024   ;;  %s293_s1 = inlined_call_operand.vmem [shape: bf16[32,32], index: 1, kind: input, shape index: {}]   ;;  %s294_s0 = inlined_call_operand.vmem [shape: bf16[16,32], index: 0, kind: input, shape index: {}]   ;;  %s295_s3 = inlined_call_operand.vmem [shape: bf16[16,32], index: 3, kind: input, shape index: {}]   ;;  %s296_s2 = inlined_call_operand.vmem [shape: f32[1,32], index: 2, kind: input, shape index: {}]   ;;  %s297_s4 = inlined_call_operand.vmem [shape: f32[1,32], index: 4, kind: input, shape index: {}]   ;;  %s298_s5 = inlined_call_operand.vmem [shape: f32[1,32], index: 5, kind: input, shape index: {}]   ;;  %s299_s6 = inlined_call_operand.vmem [shape: bf16[16,32], index: 6, kind: output, shape index: {}]  }
   0x1   :  { %203 = vmatprep.subr.bf16.mxu0 %v220_v0  ;;  %v213_v1 = vld [vmem:[%s293_s1] sm:$0xff]   ;;  %207 = vmatprep.mubr.msk.bf16.mxu0 %vm221_vm1, %v220_v0  ;;  %29 = vst.msk [vmem:[#allocation2] sm:$0xff] %vm28_vm0, %v220_v0  ;;  %30 = vst.msk [vmem:[#allocation2 + $0x8] sm:$0xff] %vm28_vm0, %v220_v0  ;;  %v214_v2 = vld [vmem:[%s293_s1 + $0x8] sm:$0xff]  }
   0x2   :  { %204 = vmatpush3.bf16.msra.mxu0 %v213_v1  ;;  %v215_v3 = vld [vmem:[%s294_s0] sm:$0xff]  }
   0x3   :  { %205 = vmatprep.subr.bf16.mxu0 %v220_v0  ;;  %v197_v12 = vld [vmem:[%s295_s3] sm:$0xff]  }
   0x4   :  { %v189_v13 = vld [vmem:[%s296_s2] ss:$0 sm:$0xff]  ;;  %v198_v14 = vunpack.c.l.bf16 %v197_v12  ;;  %v199_v17 = vunpack.c.h.bf16 %v197_v12 }
   0x5   :  { %v190_v41 = vld [vmem:[%s297_s4] ss:$0 sm:$0xff] }
   0x6   :  { %206 = vmatpush3.bf16.msra.mxu0 %v214_v2  ;;  %v191_v43 = vld [vmem:[%s298_s5] ss:$0 sm:$0xff] }
   0x8   :  { %v31_v4 = vld [vmem:[#allocation2] sm:$0xff]  ;;  %v32_v6 = vld [vmem:[#allocation2 + $0x8] sm:$0xff] }
   0x9   :  { %208 = vmatmul.mubr.msk.bf16.vlgmr.msra.gmra.mrb[0].mxu0 %vm28_vm0, %v215_v3 }
  0xdc   :  { %v94_v5 = vpop.f32.mrb[0].mxu0 }
  0xdd   :  { %v101_v7 = vadd.f32 %v94_v5, %v31_v4  ;;  %v209_v8 = vpop.f32.mrb[1].mxu0 }
  0xde   :  { %v97_v9 = vpop.f32.mrb[2].mxu0 }
  0xdf   :  { %103 = vst.msk [vmem:[#allocation2] sm:$0xff] %vm28_vm0, %v101_v7  ;;  %v102_v10 = vadd.f32 %v97_v9, %v32_v6  ;;  %v210_v11 = vpop.f32.mrb[3].mxu0 }
  0xe1   :  { %104 = vst.msk [vmem:[#allocation2 + $0x8] sm:$0xff] %vm28_vm0, %v102_v10 }
  0xe6   :  { %v108_v15 = vld [vmem:[#allocation2] sm:$0xff] }
  0xe7   :  { %v117_v16 = vadd.f32 %v189_v13, %v108_v15 }
  0xe8   :  { %v109_v18 = vld [vmem:[#allocation2 + $0x8] sm:$0xff] }
  0xe9   :  { %v123_v19 = vadd.f32 %v198_v14, %v117_v16  ;;  %v118_v20 = vadd.f32 %v189_v13, %v109_v18 }
  0xeb   :  { %v125_v21 = vsel %vm28_vm0, %v123_v19, 0.0  ;;  %v124_v22 = vadd.f32 %v199_v17, %v118_v20 }
  0xec   :  { %126 = vadd.xlane.f32.xlu0 %v125_v21 }
  0xed   :  { %v128_v23 = vsel %vm28_vm0, %v124_v22, 0.0 }
  0xf0   :  { %129 = vadd.xlane.f32.xlu0 %v128_v23 }
 0x179   :  { %v127_v24 = vpop.xlane.xlu0 %126 }
 0x17a   :  { %v132_v25 = vmul.f32 0.03125, %v127_v24 }
 0x17c   :  { %v134_v26 = vsub.f32 %v123_v19, %v132_v25 }
 0x17d   :  { %v130_v27 = vpop.xlane.xlu0 %129 }
 0x17e   :  { %v133_v28 = vmul.f32 0.03125, %v130_v27  ;;  %v136_v29 = vmul.f32 %v134_v26, %v134_v26 }
 0x180   :  { %v135_v30 = vsub.f32 %v124_v22, %v133_v28  ;;  %v138_v31 = vsel %vm28_vm0, %v136_v29, 0.0 }
 0x181   :  { %139 = vadd.xlane.f32.xlu1 %v138_v31 }
 0x182   :  { %v137_v32 = vmul.f32 %v135_v30, %v135_v30 }
 0x184   :  { %v141_v33 = vsel %vm28_vm0, %v137_v32, 0.0 }
 0x185   :  { %142 = vadd.xlane.f32.xlu1 %v141_v33 }
 0x20e   :  { %v140_v34 = vpop.xlane.xlu1 %139 }
 0x20f   :  { %v144_v35 = vmul.f32 0.03125, %v140_v34 }
 0x211   :  { %v146_v36 = vadd.f32 1e-12, %v144_v35 }
 0x212   :  { %v143_v37 = vpop.xlane.xlu1 %142 }
 0x213   :  { %216 = vrsqrt.f32 %v146_v36  ;;  %v145_v38 = vmul.f32 0.03125, %v143_v37 }
 0x215   :  { %v147_v39 = vadd.f32 1e-12, %v145_v38 }
 0x217   :  { %218 = vrsqrt.f32 %v147_v39 }
 0x21d   :  { %v217_v40 = vpop.eup %216 }
 0x21e   :  { %v150_v42 = vmul.f32 %v217_v40, %v134_v26 }
 0x220   :  { %v159_v44 = vmul.f32 %v190_v41, %v150_v42 }
 0x221   :  { %v219_v45 = vpop.eup %218 }
 0x222   :  { %v168_v46 = vadd.f32 %v191_v43, %v159_v44  ;;  %v151_v47 = vmul.f32 %v219_v45, %v135_v30 }
 0x224   :  { %v194_v48 = vpack.c.bf16 %v168_v46, %v168_v46  ;;  %v160_v49 = vmul.f32 %v190_v41, %v151_v47 }
 0x226   :  { %179 = vst.msk [vmem:[%s299_s6] sm:$0xf] %vm178_vm2, %v194_v48  ;;  %v169_v50 = vadd.f32 %v191_v43, %v160_v49 }
 0x228   :  { %v195_v51 = vpack.c.bf16 %v169_v50, %v169_v50 }
 0x22a   :  { %180 = vst.msk [vmem:[%s299_s6 + $0x4] sm:$0xf] %vm178_vm2, %v195_v51 }

// kernel: bert_detect_forward.19
= control target key start
LH: loop header
LB: loop body
LE: loop exit
PB: predicated region body
PF: predicated region fallthrough
CT: control target
= control target key end

     0   :  { %v136_v0 = vmov 0.0   ;;  %vm137_vm0 = vmmov 0   ;;  %vm46_vm1 = vcmask 261120   ;;  %s176_s1 = inlined_call_operand.vmem [shape: bf16[32,128], index: 1, kind: input, shape index: {}]   ;;  %s177_s0 = inlined_call_operand.vmem [shape: bf16[16,32], index: 0, kind: input, shape index: {}]   ;;  %s178_s2 = inlined_call_operand.vmem [shape: f32[1,128], index: 2, kind: input, shape index: {}]   ;;  %s179_s3 = inlined_call_operand.vmem [shape: f32[16,128], index: 3, kind: output, shape index: {}]  }
   0x1   :  { %123 = vmatprep.subr.bf16.mxu0 %v136_v0  ;;  %v133_v1 = vld [vmem:[%s176_s1] sm:$0xff]   ;;  %127 = vmatprep.mubr.msk.bf16.mxu0 %vm137_vm0, %v136_v0  ;;  %v134_v2 = vld [vmem:[%s176_s1 + $0x8] sm:$0xff]  }
   0x2   :  { %124 = vmatpush3.bf16.msra.mxu0 %v133_v1  ;;  %v135_v3 = vld [vmem:[%s177_s0] sm:$0xff]  }
   0x3   :  { %125 = vmatprep.subr.bf16.mxu0 %v136_v0  ;;  %v119_v4 = vld [vmem:[%s178_s2] ss:$0 sm:$0xff] }
   0x6   :  { %126 = vmatpush3.bf16.msra.mxu0 %v134_v2 }
   0x9   :  { %128 = vmatmul.mubr.msk.bf16.vlgmr.msra.gmra.mrb[0].mxu0 %vm46_vm1, %v135_v3 }
  0xdc   :  { %v84_v5 = vpop.f32.mrb[0].mxu0 }
  0xdd   :  { %v107_v6 = vadd.f32 %v119_v4, %v84_v5  ;;  %v129_v7 = vpop.f32.mrb[1].mxu0 }
  0xde   :  { %v87_v8 = vpop.f32.mrb[2].mxu0 }
  0xdf   :  { %109 = vst [vmem:[%s179_s3] sm:$0xff] %v107_v6  ;;  %v108_v9 = vadd.f32 %v119_v4, %v87_v8  ;;  %v130_v10 = vpop.f32.mrb[3].mxu0 }
  0xe1   :  { %110 = vst [vmem:[%s179_s3 + $0x8] sm:$0xff] %v108_v9 }

// kernel: bert_detect_forward.14
= control target key start
LH: loop header
LB: loop body
LE: loop exit
PB: predicated region body
PF: predicated region fallthrough
CT: control target
= control target key end

     0   :  { %v332_v0 = vmov 0.0   ;;  %vm333_vm0 = vmmov 0   ;;  %vm57_vm1 = vcmask 261120   ;;  %vm160_vm2 = vcmask 523264   ;;  %s418_s1 = inlined_call_operand.vmem [shape: bf16[32,64], index: 1, kind: input, shape index: {}]   ;;  %s419_s0 = inlined_call_operand.vmem [shape: bf16[16,32], index: 0, kind: input, shape index: {}]   ;;  %s420_s3 = inlined_call_operand.vmem [shape: bf16[64,32], index: 3, kind: input, shape index: {}]   ;;  %s421_s2 = inlined_call_operand.vmem [shape: f32[1,64], index: 2, kind: input, shape index: {}]   ;;  %s422_s4 = inlined_call_operand.vmem [shape: f32[1,32], index: 4, kind: input, shape index: {}]   ;;  %s423_s5 = inlined_call_operand.vmem [shape: f32[1,32], index: 5, kind: input, shape index: {}]   ;;  %s424_s6 = inlined_call_operand.vmem [shape: f32[1,32], index: 6, kind: input, shape index: {}]   ;;  %s425_s7 = inlined_call_operand.vmem [shape: bf16[16,32], index: 7, kind: output, shape index: {}]  }
   0x1   :  { %294 = vmatprep.subr.bf16.mxu0 %v332_v0  ;;  %v316_v1 = vld [vmem:[%s418_s1] sm:$0xff]   ;;  %298 = vmatprep.mubr.msk.bf16.mxu0 %vm333_vm0, %v332_v0  ;;  %v317_v2 = vld [vmem:[%s418_s1 + $0x8] sm:$0xff]   ;;  %v321_v6 = vld [vmem:[%s420_s3 + $0x10] sm:$0xff]   ;;  %vm262_vm3 = vcmask 257024  }
   0x2   :  { %302 = vmatprep.subr.bf16.mxu1 %v332_v0  ;;  %310 = vmatprep.mubr.msk.bf16.mxu1 %vm333_vm0, %v332_v0  ;;  %v27_v3 = vld [vmem:[%s419_s0] sm:$0xff]   ;;  %v320_v5 = vld [vmem:[%s420_s3 + $0x8] sm:$0xff]   ;;  %v322_v7 = vld [vmem:[%s420_s3 + $0x18] sm:$0xff]  }
   0x3   :  { %295 = vmatpush3.bf16.msra.mxu0 %v316_v1  ;;  %v319_v4 = vld [vmem:[%s420_s3] sm:$0xff]   ;;  %v205_v35 = vunpack.c.l.bf16 %v27_v3  ;;  %v206_v39 = vunpack.c.h.bf16 %v27_v3 }
   0x4   :  { %296 = vmatprep.subr.bf16.mxu0 %v332_v0  ;;  %303 = vmatpush3.bf16.msra.mxu1 %v319_v4  ;;  %v269_v8 = vld [vmem:[%s421_s2] ss:$0 sm:$0xff] }
   0x5   :  { %304 = vmatprep.subr.bf16.mxu1 %v332_v0  ;;  %v274_v34 = vld [vmem:[%s422_s4] ss:$0 sm:$0xff] }
   0x7   :  { %297 = vmatpush3.bf16.msra.mxu0 %v317_v2  ;;  %v281_v2 = vld [vmem:[%s424_s6] ss:$0 sm:$0xff] }
   0x8   :  { %305 = vmatpush3.bf16.msra.mxu1 %v320_v5 }
   0x9   :  { %306 = vmatprep.subr.bf16.mxu1 %v332_v0 }
   0xa   :  { %299 = vmatmul.mubr.msk.bf16.vlgmr.msra.gmra.mrb[0].mxu0 %vm57_vm1, %v27_v3 }
   0xc   :  { %307 = vmatpush3.bf16.msra.mxu1 %v321_v6 }
   0xd   :  { %308 = vmatprep.subr.bf16.mxu1 %v332_v0  ;;  %v280_v0 = vld [vmem:[%s423_s5] ss:$0 sm:$0xff] }
  0x10   :  { %309 = vmatpush3.bf16.msra.mxu1 %v322_v7 }
  0xdd   :  { %v95_v9 = vpop.f32.mrb[0].mxu0 }
  0xde   :  { %v96_v10 = vadd.f32 %v269_v8, %v95_v9  ;;  %v300_v11 = vpop.f32.mrb[1].mxu0 }
  0xdf   :  { %v98_v12 = vpop.f32.mrb[2].mxu0 }
  0xe0   :  { %v104_v13 = vmul.f32 0.044715, %v96_v10  ;;  %v99_v14 = vadd.f32 %v269_v8, %v98_v12  ;;  %v301_v15 = vpop.f32.mrb[3].mxu0  ;;  %v102_v28 = vmul.f32 0.5, %v96_v10 }
  0xe2   :  { %v106_v16 = vmul.f32 %v104_v13, %v96_v10  ;;  %v105_v17 = vmul.f32 0.044715, %v99_v14  ;;  %v103_v29 = vmul.f32 0.5, %v99_v14 }
  0xe4   :  { %v108_v18 = vmul.f32 %v106_v16, %v96_v10  ;;  %v107_v19 = vmul.f32 %v105_v17, %v99_v14 }
  0xe6   :  { %v110_v20 = vadd.f32 %v108_v18, %v96_v10  ;;  %v109_v21 = vmul.f32 %v107_v19, %v99_v14 }
  0xe8   :  { %v112_v22 = vmul.f32 0.7978846, %v110_v20  ;;  %v111_v23 = vadd.f32 %v109_v21, %v99_v14 }
  0xea   :  { %324 = vtanh.f32 %v112_v22  ;;  %v113_v24 = vmul.f32 0.7978846, %v111_v23 }
  0xec   :  { %326 = vtanh.f32 %v113_v24 }
  0xf4   :  { %v325_v25 = vpop.eup %324 }
  0xf5   :  { %v116_v26 = vadd.f32 1.0, %v325_v25 }
  0xf6   :  { %v327_v27 = vpop.eup %326 }
  0xf7   :  { %v117_v30 = vadd.f32 1.0, %v327_v27  ;;  %v118_v31 = vmul.f32 %v116_v26, %v102_v28 }
  0xf9   :  { %v119_v32 = vmul.f32 %v117_v30, %v103_v29 }
  0xfb   :  { %v120_v33 = vpack.c.bf16 %v119_v32, %v118_v31 }
  0xfd   :  { %311 = vmatmul.mubr.msk.bf16.vlgmr.msra.gmra.mrb[0].mxu1 %vm160_vm2, %v120_v33 }
 0x1d0   :  { %v198_v36 = vpop.f32.mrb[0].mxu1 }
 0x1d1   :  { %v199_v37 = vadd.f32 %v274_v34, %v198_v36  ;;  %v312_v38 = vpop.f32.mrb[1].mxu1 }
 0x1d2   :  { %v201_v40 = vpop.f32.mrb[2].mxu1 }
 0x1d3   :  { %v202_v41 = vadd.f32 %v274_v34, %v201_v40  ;;  %v313_v42 = vpop.f32.mrb[3].mxu1  ;;  %v207_v43 = vadd.f32 %v205_v35, %v199_v37 }
 0x1d5   :  { %v209_v44 = vsel %vm57_vm1, %v207_v43, 0.0  ;;  %v208_v45 = vadd.f32 %v206_v39, %v202_v41 }
 0x1d6   :  { %210 = vadd.xlane.f32.xlu0 %v209_v44 }
 0x1d7   :  { %v212_v46 = vsel %vm57_vm1, %v208_v45, 0.0 }
 0x1da   :  { %213 = vadd.xlane.f32.xlu0 %v212_v46 }
 0x263   :  { %v211_v47 = vpop.xlane.xlu0 %210 }
 0x264   :  { %v216_v48 = vmul.f32 0.03125, %v211_v47 }
 0x266   :  { %v218_v49 = vsub.f32 %v207_v43, %v216_v48 }
 0x267   :  { %v214_v50 = vpop.xlane.xlu0 %213 }
 0x268   :  { %v217_v51 = vmul.f32 0.03125, %v214_v50  ;;  %v220_v52 = vmul.f32 %v218_v49, %v218_v49 }
 0x26a   :  { %v219_v53 = vsub.f32 %v208_v45, %v217_v51  ;;  %v222_v54 = vsel %vm57_vm1, %v220_v52, 0.0 }
 0x26b   :  { %223 = vadd.xlane.f32.xlu1 %v222_v54 }
 0x26c   :  { %v221_v55 = vmul.f32 %v219_v53, %v219_v53 }
 0x26e   :  { %v225_v56 = vsel %vm57_vm1, %v221_v55, 0.0 }
 0x26f   :  { %226 = vadd.xlane.f32.xlu1 %v225_v56 }
 0x2f8   :  { %v224_v57 = vpop.xlane.xlu1 %223 }
 0x2f9   :  { %v228_v58 = vmul.f32 0.03125, %v224_v57 }
 0x2fb   :  { %v230_v59 = vadd.f32 1e-12, %v228_v58 }
 0x2fc   :  { %v227_v60 = vpop.xlane.xlu1 %226 }
 0x2fd   :  { %328 = vrsqrt.f32 %v230_v59  ;;  %v229_v61 = vmul.f32 0.03125, %v227_v60 }
 0x2ff   :  { %v231_v62 = vadd.f32 1e-12, %v229_v61 }
 0x301   :  { %330 = vrsqrt.f32 %v231_v62 }
 0x307   :  { %v329_v63 = vpop.eup %328 }
 0x308   :  { %v234_v1 = vmul.f32 %v329_v63, %v218_v49 }
 0x30a   :  { %v243_v3 = vmul.f32 %v280_v0, %v234_v1 }
 0x30b   :  { %v331_v4 = vpop.eup %330 }
 0x30c   :  { %v252_v5 = vadd.f32 %v281_v2, %v243_v3  ;;  %v235_v6 = vmul.f32 %v331_v4, %v219_v53 }
 0x30e   :  { %v284_v7 = vpack.c.bf16 %v252_v5, %v252_v5  ;;  %v244_v8 = vmul.f32 %v280_v0, %v235_v6 }
 0x310   :  { %263 = vst.msk [vmem:[%s425_s7] sm:$0xf] %vm262_vm3, %v284_v7  ;;  %v253_v9 = vadd.f32 %v281_v2, %v244_v8 }
 0x312   :  { %v285_v10 = vpack.c.bf16 %v253_v9, %v253_v9 }
 0x314   :  { %264 = vst.msk [vmem:[%s425_s7 + $0x4] sm:$0xf] %vm262_vm3, %v285_v10 }

</bundles_post_ra>
